<compile_context>
chip_gen: v6e
topology: v6e:2x2x1
jax: 0.10.0
libtpu: 0.0.40
codegen_flags: <defaults>
</compile_context>

<pallas_src>
import jax
import jax.numpy as jnp
from jax.experimental import pallas as pl
from jax.experimental.pallas import tpu as pltpu

NUM_HEADS = 8
HEAD_DIM = 10   # hard-coded in the PyTorch module (__init__)


def _attn_kernel(q_ref, kt_ref, v_ref, o_ref):
    """Per-head attention, batched over the leading (batch*heads) dim.

    q_ref, v_ref : (B*H, L, D)  head-split query / value
    kt_ref       : (B*H, D, L)  head-split key, already transposed per head
    o_ref        : (B*H, L)     final per-head output rows (L == D == 10)
    """
    q = q_ref[...]
    kt = kt_ref[...]
    v = v_ref[...]
    scale = 1.0 / (q.shape[-1] ** 0.5)

    # attn_score = softmax(tanh(q * k^T / sqrt(d)), axis=-1)
    # tanh bounds the logits to [-1, 1] -> exp cannot overflow -> the usual
    # max-shift is safely skipped.
    s = jnp.tanh(q * kt * scale)                                    # (BH, L, D)
    e = jnp.exp(s)
    p = e * pl.reciprocal(jnp.sum(e, axis=-1, keepdims=True), approx=True)

    t = p * v                            # t_out                     (BH, L, D)
    col = jnp.sum(t, axis=1)             # v_query == v_key          (BH, D)
    row = jnp.sum(t, axis=2)             # v_value (per head)        (BH, L)

    # v_attn = softmax(tanh(v_query * v_key), axis=-1); tanh-bounded again.
    ea = jnp.exp(jnp.tanh(col * col))                               # (BH, D)
    pa = ea * pl.reciprocal(jnp.sum(ea, axis=-1, keepdims=True), approx=True)

    # out = v_value * v_attn  (elementwise; L == D).  One store of the whole
    # (B*H, L) result slab.
    o_ref[...] = (row * pa).astype(o_ref.dtype)


@jax.jit
def attention_layer2(query, key, value):
    """query/key/value: (B, L, H*D) -> (B, H, head_dim), as in AttentionLayer2."""
    B, L, M = query.shape
    H, D = NUM_HEADS, HEAD_DIM
    assert M == H * D, "model dim must be num_heads * head_dim"
    assert L == D, "torch broadcasting in this module requires seq_len == head_dim"

    # Head split (free minor-dim reshape) + head-major relayout.  The per-head
    # key transpose (k -> k^T) is fused into the same tiny wrapper-side
    # transpose, exactly (no in-kernel MXU/XLU transpose, no per-head slices).
    qh = query.reshape(B, L, H, D).transpose(0, 2, 1, 3).reshape(B * H, L, D)
    vh = value.reshape(B, L, H, D).transpose(0, 2, 1, 3).reshape(B * H, L, D)
    kt = key.reshape(B, L, H, D).transpose(0, 2, 3, 1).reshape(B * H, D, L)

    out2d = pl.pallas_call(
        _attn_kernel,
        out_shape=jax.ShapeDtypeStruct((B * H, L), query.dtype),
        # Whole-array VMEM blocks, no grid: avoids the grid-step scaffolding
        # and input double-buffering for a ~19 KB, launch-latency-bound kernel.
        in_specs=[pl.BlockSpec(memory_space=pltpu.MemorySpace.VMEM)] * 3,
        out_specs=pl.BlockSpec(memory_space=pltpu.MemorySpace.VMEM),
    )(qh, kt, vh)

    # (B*H, L) -> (B, H, L): leading-dim split, free.
    return out2d.reshape(B, H, L)


def _reference(query, key, value, num_heads=NUM_HEADS, head_dim=HEAD_DIM):
    """Pure-JAX transcription of the PyTorch forward, for validation."""
    B, L, _ = query.shape
    H, D = num_heads, head_dim

    def split_heads(x):
        return jnp.transpose(x.reshape(B, L, H, D), (2, 0, 1, 3))   # (H, B, L, D)

    q, k, v = split_heads(query), split_heads(key), split_heads(value)
    kT = jnp.swapaxes(k, -1, -2)
    s = jnp.tanh(q * kT / (D ** 0.5))
    p = jax.nn.softmax(s, axis=-1)
    t = p * v
    v_q = t.sum(2)
    v_k = t.sum(2)
    v_val = jnp.transpose(t.sum(3), (1, 0, 2))
    v_attn = jnp.transpose(jnp.tanh(v_q * v_k), (1, 0, 2))
    v_attn = jax.nn.softmax(v_attn, axis=-1)
    return v_val * v_attn


if __name__ == "__main__":
    # No learned parameters in this module; only deterministic inputs needed.
    root = jax.random.PRNGKey(0)
    kq, kk, kv = jax.random.split(root, 3)

    B = 2
    L = HEAD_DIM                 # seq length must equal head_dim (=10)
    M = NUM_HEADS * HEAD_DIM     # model dim = 80

    query = jax.random.normal(kq, (B, L, M), dtype=jnp.float32)
    key_in = jax.random.normal(kk, (B, L, M), dtype=jnp.float32)
    value = jax.random.normal(kv, (B, L, M), dtype=jnp.float32)

    out = jax.block_until_ready(attention_layer2(query, key_in, value))

    assert out.shape == (B, NUM_HEADS, HEAD_DIM)
    ref = _reference(query, key_in, value)
    # Only approximate step is the EUP reciprocal in the two softmax
    # denominators (rel. err. ~2^-12 or better on well-conditioned inputs);
    # everything else matches the f32 reference to ~1e-6.
    assert jnp.allclose(out, ref, atol=2e-3, rtol=2e-3), "mismatch vs JAX reference"

    print("KERNEL_OK")
</pallas_src>

<mosaic_0001>
module attributes {stable_mosaic.version = 11 : i64} {
  func.func @_attn_kernel(%arg0: memref<16x10x10xf32, #tpu.memory_space<vmem>>, %arg1: memref<16x10x10xf32, #tpu.memory_space<vmem>>, %arg2: memref<16x10x10xf32, #tpu.memory_space<vmem>>, %arg3: memref<16x10xf32, #tpu.memory_space<vmem>>) attributes {dimension_semantics = [], scalar_prefetch = 0 : i64, scratch_operands = 0 : i64, tpu.core_type = #tpu.core_type<tc>} {
    %c0 = arith.constant 0 : index
    %c0_0 = arith.constant 0 : index
    %c0_1 = arith.constant 0 : index
    %0 = vector.load %arg0[%c0, %c0_0, %c0_1] : memref<16x10x10xf32, #tpu.memory_space<vmem>>, vector<16x10x10xf32>
    %c0_2 = arith.constant 0 : index
    %c0_3 = arith.constant 0 : index
    %c0_4 = arith.constant 0 : index
    %1 = vector.load %arg1[%c0_2, %c0_3, %c0_4] : memref<16x10x10xf32, #tpu.memory_space<vmem>>, vector<16x10x10xf32>
    %c0_5 = arith.constant 0 : index
    %c0_6 = arith.constant 0 : index
    %c0_7 = arith.constant 0 : index
    %2 = vector.load %arg2[%c0_5, %c0_6, %c0_7] : memref<16x10x10xf32, #tpu.memory_space<vmem>>, vector<16x10x10xf32>
    %3 = arith.mulf %0, %1 : vector<16x10x10xf32>
    %cst = arith.constant 0.316227764 : f32
    %4 = vector.broadcast %cst : f32 to vector<16x10x10xf32>
    %5 = arith.mulf %3, %4 : vector<16x10x10xf32>
    %6 = math.tanh %5 : vector<16x10x10xf32>
    %7 = math.exp %6 : vector<16x10x10xf32>
    %cst_8 = arith.constant dense<0.000000e+00> : vector<16x10xf32>
    %8 = vector.multi_reduction <add>, %7, %cst_8 [2] : vector<16x10x10xf32> to vector<16x10xf32>
    %9 = vector.shape_cast %8 : vector<16x10xf32> to vector<16x10x1xf32>
    %10 = tpu.reciprocal %9 {approx = true} : vector<16x10x1xf32> -> vector<16x10x1xf32>
    %11 = vector.broadcast %10 : vector<16x10x1xf32> to vector<16x10x10xf32>
    %12 = arith.mulf %7, %11 : vector<16x10x10xf32>
    %13 = arith.mulf %12, %2 : vector<16x10x10xf32>
    %cst_9 = arith.constant dense<0.000000e+00> : vector<16x10xf32>
    %14 = vector.multi_reduction <add>, %13, %cst_9 [1] : vector<16x10x10xf32> to vector<16x10xf32>
    %cst_10 = arith.constant dense<0.000000e+00> : vector<16x10xf32>
    %15 = vector.multi_reduction <add>, %13, %cst_10 [2] : vector<16x10x10xf32> to vector<16x10xf32>
    %16 = arith.mulf %14, %14 : vector<16x10xf32>
    %17 = math.tanh %16 : vector<16x10xf32>
    %18 = math.exp %17 : vector<16x10xf32>
    %cst_11 = arith.constant dense<0.000000e+00> : vector<16xf32>
    %19 = vector.multi_reduction <add>, %18, %cst_11 [1] : vector<16x10xf32> to vector<16xf32>
    %20 = vector.shape_cast %19 : vector<16xf32> to vector<16x1xf32>
    %21 = tpu.reciprocal %20 {approx = true} : vector<16x1xf32> -> vector<16x1xf32>
    %22 = vector.broadcast %21 : vector<16x1xf32> to vector<16x10xf32>
    %23 = arith.mulf %18, %22 : vector<16x10xf32>
    %24 = arith.mulf %15, %23 : vector<16x10xf32>
    %c0_12 = arith.constant 0 : index
    %c0_13 = arith.constant 0 : index
    %25 = vector.load %arg3[%c0_12, %c0_13] : memref<16x10xf32, #tpu.memory_space<vmem>>, vector<16x10xf32>
    tpu.vector_store %arg3[%c0_12, %c0_13], %24 {strides = array<i32>} : memref<16x10xf32, #tpu.memory_space<vmem>>, vector<16x10xf32>,
    return
  }
}

</mosaic_0001>

<bundles_post_ra>
// kernel: attention_layer2.1
= control target key start
LH: loop header
LB: loop body
LE: loop exit
PB: predicated region body
PF: predicated region fallthrough
CT: control target
= control target key end

     0   :  { %vm271_vm0 = vcmask 80896   ;;  %vm275_vm1 = vcmask 74752   ;;  %s2562_s0 = inlined_call_operand.vmem [shape: f32[16,10,10], index: 0, kind: input, shape index: {}]   ;;  %s2563_s1 = inlined_call_operand.vmem [shape: f32[16,10,10], index: 1, kind: input, shape index: {}]   ;;  %s2564_s2 = inlined_call_operand.vmem [shape: f32[16,10,10], index: 2, kind: input, shape index: {}]   ;;  %s2565_s3 = inlined_call_operand.hbm [shape: f32[16,10], index: 3, kind: output, shape index: {}]  }
   0x1   :  { %v17_v0 = vld [vmem:[%s2562_s0 + $0x10] sm:$0xff]  ;;  %v15_v2 = vld [vmem:[%s2562_s0] sm:$0xff]  ;;  %v18_v5 = vld [vmem:[%s2562_s0 + $0x18] sm:$0x3] }
   0x2   :  { %v49_v1 = vld [vmem:[%s2563_s1 + $0x10] sm:$0xff]  ;;  %v47_v4 = vld [vmem:[%s2563_s1] sm:$0xff]  ;;  %v50_v6 = vld [vmem:[%s2563_s1 + $0x18] sm:$0x3] }
   0x3   :  { %v113_v3 = vmul.f32 %v49_v1, %v17_v0  ;;  %v111_v7 = vmul.f32 %v47_v4, %v15_v2  ;;  %v114_v8 = vmul.f32 %v50_v6, %v18_v5  ;;  %v16_v9 = vld [vmem:[%s2562_s0 + $0x8] sm:$0x3]  ;;  %v31_v15 = vld [vmem:[%s2562_s0 + $0x80] sm:$0xff]  ;;  %v34_v21 = vld [vmem:[%s2562_s0 + $0x98] sm:$0x3] }
   0x4   :  { %v48_v10 = vld [vmem:[%s2563_s1 + $0x8] sm:$0x3]  ;;  %v63_v16 = vld [vmem:[%s2563_s1 + $0x80] sm:$0xff]  ;;  %v66_v23 = vld [vmem:[%s2563_s1 + $0x98] sm:$0x3] }
   0x5   :  { %v32_v11 = vld [vmem:[%s2562_s0 + $0x88] sm:$0x3]  ;;  %v145_v12 = vmul.f32 0.31622776, %v113_v3  ;;  %v112_v13 = vmul.f32 %v48_v10, %v16_v9  ;;  %v143_v17 = vmul.f32 0.31622776, %v111_v7  ;;  %v127_v20 = vmul.f32 %v63_v16, %v31_v15 }
   0x6   :  { %v64_v14 = vld [vmem:[%s2563_s1 + $0x88] sm:$0x3]  ;;  %v146_v18 = vmul.f32 0.31622776, %v114_v8  ;;  %v33_v24 = vld [vmem:[%s2562_s0 + $0x90] sm:$0xff]  ;;  %v130_v28 = vmul.f32 %v66_v23, %v34_v21  ;;  %v19_v32 = vld [vmem:[%s2562_s0 + $0x20] sm:$0xff] }
   0x7   :  { %v128_v19 = vmul.f32 %v64_v14, %v32_v11  ;;  %1404 = vtanh.f32 %v145_v12  ;;  %v144_v22 = vmul.f32 0.31622776, %v112_v13  ;;  %v65_v25 = vld [vmem:[%s2563_s1 + $0x90] sm:$0xff]  ;;  %v159_v27 = vmul.f32 0.31622776, %v127_v20  ;;  %v51_v33 = vld [vmem:[%s2563_s1 + $0x20] sm:$0xff] }
   0x8   :  { %1406 = vtanh.f32 %v143_v17  ;;  %v20_v29 = vld [vmem:[%s2562_s0 + $0x28] sm:$0x3]  ;;  %v129_v30 = vmul.f32 %v65_v25, %v33_v24  ;;  %v162_v34 = vmul.f32 0.31622776, %v130_v28  ;;  %v115_v36 = vmul.f32 %v51_v33, %v19_v32  ;;  %v35_v41 = vld [vmem:[%s2562_s0 + $0xa0] sm:$0xff]  ;;  %v21_v50 = vld [vmem:[%s2562_s0 + $0x30] sm:$0xff] }
   0x9   :  { %v160_v26 = vmul.f32 0.31622776, %v128_v19  ;;  %1408 = vtanh.f32 %v146_v18  ;;  %v52_v31 = vld [vmem:[%s2563_s1 + $0x28] sm:$0x3]  ;;  %v67_v42 = vld [vmem:[%s2563_s1 + $0xa0] sm:$0xff]  ;;  %v53_v51 = vld [vmem:[%s2563_s1 + $0x30] sm:$0xff] }
   0xa   :  { %1410 = vtanh.f32 %v144_v22  ;;  %v116_v35 = vmul.f32 %v52_v31, %v20_v29  ;;  %v36_v37 = vld [vmem:[%s2562_s0 + $0xa8] sm:$0x3]  ;;  %v161_v39 = vmul.f32 0.31622776, %v129_v30  ;;  %v22_v43 = vld [vmem:[%s2562_s0 + $0x38] sm:$0x3]  ;;  %v131_v46 = vmul.f32 %v67_v42, %v35_v41 }
   0xb   :  { %v68_v38 = vld [vmem:[%s2563_s1 + $0xa8] sm:$0x3]  ;;  %1412 = vtanh.f32 %v160_v26  ;;  %v147_v45 = vmul.f32 0.31622776, %v115_v36  ;;  %v54_v47 = vld [vmem:[%s2563_s1 + $0x38] sm:$0x3]  ;;  %v117_v54 = vmul.f32 %v53_v51, %v21_v50 }
   0xc   :  { %v132_v40 = vmul.f32 %v68_v38, %v36_v37  ;;  %1414 = vtanh.f32 %v159_v27  ;;  %v148_v44 = vmul.f32 0.31622776, %v116_v35  ;;  %v118_v49 = vmul.f32 %v54_v47, %v22_v43  ;;  %v38_v52 = vld [vmem:[%s2562_s0 + $0xb8] sm:$0x3]  ;;  %v37_v56 = vld [vmem:[%s2562_s0 + $0xb0] sm:$0xff]  ;;  %v23_v13 = vld [vmem:[%s2562_s0 + $0x40] sm:$0xff] }
   0xd   :  { %1416 = vtanh.f32 %v162_v34  ;;  %v163_v53 = vmul.f32 0.31622776, %v131_v46  ;;  %v70_v55 = vld [vmem:[%s2563_s1 + $0xb8] sm:$0x3]  ;;  %v69_v57 = vld [vmem:[%s2563_s1 + $0xb0] sm:$0xff]  ;;  %v55_v14 = vld [vmem:[%s2563_s1 + $0x40] sm:$0xff] }
   0xe   :  { %v164_v48 = vmul.f32 0.31622776, %v132_v40  ;;  %1418 = vtanh.f32 %v161_v39  ;;  %v150_v58 = vmul.f32 0.31622776, %v118_v49  ;;  %v134_v59 = vmul.f32 %v70_v55, %v38_v52  ;;  %v24_v9 = vld [vmem:[%s2562_s0 + $0x48] sm:$0x3] }
   0xf   :  { %1420 = vtanh.f32 %v148_v44  ;;  %v133_v60 = vmul.f32 %v69_v57, %v37_v56  ;;  %v149_v61 = vmul.f32 0.31622776, %v117_v54  ;;  %v56_v10 = vld [vmem:[%s2563_s1 + $0x48] sm:$0x3]  ;;  %v119_v24 = vmul.f32 %v55_v14, %v23_v13  ;;  %v39_v25 = vld [vmem:[%s2562_s0 + $0xc0] sm:$0xff]  ;;  %v25_v41 = vld [vmem:[%s2562_s0 + $0x50] sm:$0xff] }
  0x10   :  { %1422 = vtanh.f32 %v147_v45  ;;  %v166_v62 = vmul.f32 0.31622776, %v134_v59  ;;  %v40_v17 = vld [vmem:[%s2562_s0 + $0xc8] sm:$0x3]  ;;  %v120_v21 = vmul.f32 %v56_v10, %v24_v9  ;;  %v71_v26 = vld [vmem:[%s2563_s1 + $0xc0] sm:$0xff]  ;;  %v57_v42 = vld [vmem:[%s2563_s1 + $0x50] sm:$0xff] }
  0x11   :  { %1424 = vtanh.f32 %v164_v48  ;;  %v165_v63 = vmul.f32 0.31622776, %v133_v60  ;;  %v72_v18 = vld [vmem:[%s2563_s1 + $0xc8] sm:$0x3]  ;;  %v26_v32 = vld [vmem:[%s2562_s0 + $0x58] sm:$0x3]  ;;  %v135_v37 = vmul.f32 %v71_v26, %v39_v25 }
  0x12   :  { %1426 = vtanh.f32 %v163_v53  ;;  %v136_v29 = vmul.f32 %v72_v18, %v40_v17  ;;  %v58_v33 = vld [vmem:[%s2563_s1 + $0x58] sm:$0x3]  ;;  %v152_v36 = vmul.f32 0.31622776, %v120_v21  ;;  %v151_v40 = vmul.f32 0.31622776, %v119_v24 }
  0x13   :  { %1428 = vtanh.f32 %v150_v58  ;;  %v122_v46 = vmul.f32 %v58_v33, %v26_v32 }
  0x14   :  { %v1405_v0 = vpop.eup %1404  ;;  %1430 = vtanh.f32 %v149_v61  ;;  %v168_v45 = vmul.f32 0.31622776, %v136_v29 }
  0x15   :  { %v1407_v1 = vpop.eup %1406  ;;  %v211_v2 = vmul.f32 1.442695, %v1405_v0  ;;  %1432 = vtanh.f32 %v166_v62 }
  0x16   :  { %v1409_v3 = vpop.eup %1408  ;;  %v207_v4 = vmul.f32 1.442695, %v1407_v1  ;;  %1434 = vtanh.f32 %v165_v63 }
  0x17   :  { %v1411_v5 = vpop.eup %1410  ;;  %1436 = vpow2.f32 %v211_v2  ;;  %v213_v6 = vmul.f32 1.442695, %v1409_v3 }
  0x18   :  { %v1413_v7 = vpop.eup %1412  ;;  %1438 = vpow2.f32 %v207_v4  ;;  %v209_v8 = vmul.f32 1.442695, %v1411_v5 }
  0x19   :  { %v1415_v11 = vpop.eup %1414  ;;  %1440 = vpow2.f32 %v213_v6  ;;  %v241_v12 = vmul.f32 1.442695, %v1413_v7 }
  0x1a   :  { %v1417_v15 = vpop.eup %1416  ;;  %1442 = vpow2.f32 %v209_v8  ;;  %v239_v16 = vmul.f32 1.442695, %v1415_v11 }
  0x1b   :  { %v1419_v19 = vpop.eup %1418  ;;  %1444 = vpow2.f32 %v241_v12  ;;  %v245_v20 = vmul.f32 1.442695, %v1417_v15 }
  0x1c   :  { %v1421_v22 = vpop.eup %1420  ;;  %1446 = vpow2.f32 %v239_v16  ;;  %v243_v23 = vmul.f32 1.442695, %v1419_v19 }
  0x1d   :  { %v1423_v27 = vpop.eup %1422  ;;  %1448 = vpow2.f32 %v245_v20  ;;  %v217_v28 = vmul.f32 1.442695, %v1421_v22 }
  0x1e   :  { %v1425_v30 = vpop.eup %1424  ;;  %1450 = vpow2.f32 %v243_v23  ;;  %v215_v31 = vmul.f32 1.442695, %v1423_v27 }
  0x1f   :  { %v1427_v34 = vpop.eup %1426  ;;  %1452 = vpow2.f32 %v217_v28  ;;  %v249_v35 = vmul.f32 1.442695, %v1425_v30 }
  0x20   :  { %v1429_v38 = vpop.eup %1428  ;;  %1454 = vpow2.f32 %v215_v31  ;;  %v247_v39 = vmul.f32 1.442695, %v1427_v34 }
  0x21   :  { %v1431_v43 = vpop.eup %1430  ;;  %1456 = vpow2.f32 %v249_v35  ;;  %v221_v44 = vmul.f32 1.442695, %v1429_v38 }
  0x22   :  { %8 = vsyncpa [#allocation3], 0  ;;  %v1433_v47 = vpop.eup %1432  ;;  %1458 = vpow2.f32 %v247_v39  ;;  %v219_v48 = vmul.f32 1.442695, %v1431_v43  ;;  %v42_v49 = vld [vmem:[%s2562_s0 + $0xd8] sm:$0x3]  ;;  %v121_v54 = vmul.f32 %v57_v42, %v25_v41 }
  0x23   :  { %v74_v50 = vld [vmem:[%s2563_s1 + $0xd8] sm:$0x3]  ;;  %v1435_v51 = vpop.eup %1434  ;;  %1460 = vpow2.f32 %v221_v44  ;;  %v253_v52 = vmul.f32 1.442695, %v1433_v47  ;;  %v167_v53 = vmul.f32 0.31622776, %v135_v37 }
  0x24   :  { %v41_v55 = vld [vmem:[%s2562_s0 + $0xd0] sm:$0xff]  ;;  %v1854_v57 = vpop.eup %1436  ;;  %1462 = vpow2.f32 %v219_v48  ;;  %v251_v58 = vmul.f32 1.442695, %v1435_v51  ;;  %v28_v59 = vld [vmem:[%s2562_s0 + $0x68] sm:$0x3]  ;;  %v138_v0 = vmul.f32 %v74_v50, %v42_v49  ;;  %v27_v1 = vld [vmem:[%s2562_s0 + $0x60] sm:$0xff] }
  0x25   :  { %v73_v56 = vld [vmem:[%s2563_s1 + $0xd0] sm:$0xff]  ;;  %v60_v60 = vld [vmem:[%s2563_s1 + $0x68] sm:$0x3]  ;;  %v1862_v61 = vpop.eup %1438  ;;  %v279_v62 = vsel %vm271_vm0, %v1854_v57, 0.0  ;;  %1464 = vpow2.f32 %v253_v52  ;;  %v154_v63 = vmul.f32 0.31622776, %v122_v46 }
  0x26   :  { %v59_v2 = vld [vmem:[%s2563_s1 + $0x60] sm:$0xff]  ;;  %v1872_v3 = vpop.eup %1440  ;;  %280 = vadd.xlane.f32.xlu1 %v279_v62  ;;  %v272_v4 = vsel %vm271_vm0, %v1862_v61, 0.0  ;;  %1466 = vpow2.f32 %v251_v58  ;;  %v137_v5 = vmul.f32 %v73_v56, %v41_v55  ;;  %v44_v6 = vld [vmem:[%s2562_s0 + $0xe8] sm:$0x3]  ;;  %v153_v10 = vmul.f32 0.31622776, %v121_v54 }
  0x27   :  { %v76_v7 = vld [vmem:[%s2563_s1 + $0xe8] sm:$0x3]  ;;  %v1882_v8 = vpop.eup %1442  ;;  %273 = vadd.xlane.f32.xlu0 %v272_v4  ;;  %v282_v9 = vsel %vm275_vm1, %v1872_v3, 0.0  ;;  %1468 = vtanh.f32 %v152_v36  ;;  %v124_v11 = vmul.f32 %v60_v60, %v28_v59  ;;  %v43_v12 = vld [vmem:[%s2562_s0 + $0xe0] sm:$0xff]  ;;  %v123_v16 = vmul.f32 %v59_v2, %v27_v1  ;;  %v30_v17 = vld [vmem:[%s2562_s0 + $0x78] sm:$0x3] }
  0x28   :  { %v75_v13 = vld [vmem:[%s2563_s1 + $0xe0] sm:$0xff]  ;;  %v1892_v14 = vpop.eup %1444  ;;  %v276_v15 = vsel %vm275_vm1, %v1882_v8, 0.0  ;;  %1470 = vtanh.f32 %v151_v40  ;;  %v62_v18 = vld [vmem:[%s2563_s1 + $0x78] sm:$0x3]  ;;  %v170_v20 = vmul.f32 0.31622776, %v138_v0  ;;  %v140_v21 = vmul.f32 %v76_v7, %v44_v6 }
  0x29   :  { %v1902_v19 = vpop.eup %1446  ;;  %1472 = vtanh.f32 %v168_v45  ;;  %v29_v22 = vld [vmem:[%s2562_s0 + $0x70] sm:$0xff]  ;;  %v169_v25 = vmul.f32 0.31622776, %v137_v5  ;;  %v139_v26 = vmul.f32 %v75_v13, %v43_v12  ;;  %v46_v27 = vld [vmem:[%s2562_s0 + $0xf8] sm:$0x3]  ;;  %v324_v30 = vsel %vm275_vm1, %v1892_v14, 0.0 }
  0x2a   :  { %v61_v23 = vld [vmem:[%s2563_s1 + $0x70] sm:$0xff]  ;;  %v1910_v24 = vpop.eup %1448  ;;  %283 = vadd.xlane.f32.xlu1 %v282_v9  ;;  %1474 = vtanh.f32 %v167_v53  ;;  %v78_v28 = vld [vmem:[%s2563_s1 + $0xf8] sm:$0x3]  ;;  %v156_v31 = vmul.f32 0.31622776, %v124_v11  ;;  %v126_v32 = vmul.f32 %v62_v18, %v30_v17  ;;  %v321_v36 = vsel %vm271_vm0, %v1902_v19, 0.0 }
  0x2b   :  { %v1918_v29 = vpop.eup %1450  ;;  %277 = vadd.xlane.f32.xlu0 %v276_v15  ;;  %1476 = vtanh.f32 %v154_v63  ;;  %v45_v33 = vld [vmem:[%s2562_s0 + $0xf0] sm:$0xff]  ;;  %v155_v37 = vmul.f32 0.31622776, %v123_v16  ;;  %v125_v38 = vmul.f32 %v61_v23, %v29_v22  ;;  %v172_v40 = vmul.f32 0.31622776, %v140_v21 }
  0x2c   :  { %v77_v34 = vld [vmem:[%s2563_s1 + $0xf0] sm:$0xff]  ;;  %v1928_v35 = vpop.eup %1452  ;;  %1478 = vtanh.f32 %v153_v10  ;;  %v142_v41 = vmul.f32 %v78_v28, %v46_v27  ;;  %v171_v43 = vmul.f32 0.31622776, %v139_v26  ;;  %v330_v46 = vsel %vm275_vm1, %v1910_v24, 0.0 }
  0x2d   :  { %v1932_v39 = vpop.eup %1454  ;;  %1480 = vtanh.f32 %v170_v20  ;;  %v141_v44 = vmul.f32 %v77_v34, %v45_v33  ;;  %v158_v47 = vmul.f32 0.31622776, %v126_v32  ;;  %v327_v49 = vsel %vm271_vm0, %v1918_v29, 0.0 }
  0x2e   :  { %v1934_v42 = vpop.eup %1456  ;;  %325 = vadd.xlane.f32.xlu1 %v324_v30  ;;  %1482 = vtanh.f32 %v169_v25  ;;  %v157_v50 = vmul.f32 0.31622776, %v125_v38  ;;  %v174_v52 = vmul.f32 0.31622776, %v142_v41  ;;  %v288_v56 = vsel %vm275_vm1, %v1928_v35, 0.0 }
  0x2f   :  { %v1936_v45 = vpop.eup %1458  ;;  %322 = vadd.xlane.f32.xlu0 %v321_v36  ;;  %1484 = vtanh.f32 %v156_v31  ;;  %v173_v54 = vmul.f32 0.31622776, %v141_v44  ;;  %v285_v59 = vsel %vm271_vm0, %v1932_v39, 0.0  ;;  %v336_v2 = vsel %vm275_vm1, %v1934_v42, 0.0 }
  0x30   :  { %v1940_v48 = vpop.eup %1460  ;;  %1486 = vtanh.f32 %v155_v37  ;;  %v333_v6 = vsel %vm271_vm0, %v1936_v45, 0.0  ;;  %vm753_vm2 = vcmask 1041409   ;;  %vm755_vm3 = vcmask 1042434  }
  0x31   :  { %v1944_v51 = vpop.eup %1462  ;;  %1488 = vtanh.f32 %v172_v40  ;;  %v294_v15 = vsel %vm275_vm1, %v1940_v48, 0.0  ;;  %vm757_vm4 = vcmask 1043459   ;;  %vm759_vm5 = vcmask 1044484  }
  0x32   :  { %v1946_v53 = vpop.eup %1464  ;;  %331 = vadd.xlane.f32.xlu1 %v330_v46  ;;  %1490 = vtanh.f32 %v171_v43  ;;  %v291_v18 = vsel %vm271_vm0, %v1944_v51, 0.0  ;;  %vm761_vm6 = vcmask 1045509   ;;  %vm763_vm7 = vcmask 1046534  }
  0x33   :  { %v1948_v55 = vpop.eup %1466  ;;  %328 = vadd.xlane.f32.xlu0 %v327_v49  ;;  %1492 = vtanh.f32 %v158_v47  ;;  %v342_v25 = vsel %vm275_vm1, %v1946_v53, 0.0  ;;  %vm765_vm8 = vcmask 1047559   ;;  %vm1227_vm9 = vcmask 130112  }
  0x34   :  { %v1469_v58 = vpop.eup %1468  ;;  %1494 = vtanh.f32 %v157_v50  ;;  %v339_v28 = vsel %vm271_vm0, %v1948_v55, 0.0 }
  0x35   :  { %v1471_v60 = vpop.eup %1470  ;;  %v225_v62 = vmul.f32 1.442695, %v1469_v58  ;;  %1496 = vtanh.f32 %v174_v52 }
  0x36   :  { %v1473_v63 = vpop.eup %1472  ;;  %289 = vadd.xlane.f32.xlu1 %v288_v56  ;;  %v223_v0 = vmul.f32 1.442695, %v1471_v60  ;;  %1498 = vtanh.f32 %v173_v54 }
  0x37   :  { %v1475_v1 = vpop.eup %1474  ;;  %286 = vadd.xlane.f32.xlu0 %v285_v59  ;;  %1500 = vpow2.f32 %v225_v62  ;;  %v257_v4 = vmul.f32 1.442695, %v1473_v63 }
  0x38   :  { %v1477_v5 = vpop.eup %1476  ;;  %1502 = vpow2.f32 %v223_v0  ;;  %v255_v7 = vmul.f32 1.442695, %v1475_v1 }
  0x39   :  { %v1479_v9 = vpop.eup %1478  ;;  %1504 = vpow2.f32 %v257_v4  ;;  %v229_v10 = vmul.f32 1.442695, %v1477_v5 }
  0x3a   :  { %v1481_v11 = vpop.eup %1480  ;;  %337 = vadd.xlane.f32.xlu1 %v336_v2  ;;  %1506 = vpow2.f32 %v255_v7  ;;  %v227_v12 = vmul.f32 1.442695, %v1479_v9 }
  0x3b   :  { %v1483_v13 = vpop.eup %1482  ;;  %334 = vadd.xlane.f32.xlu0 %v333_v6  ;;  %1508 = vpow2.f32 %v229_v10  ;;  %v261_v16 = vmul.f32 1.442695, %v1481_v11 }
  0x3c   :  { %v1485_v17 = vpop.eup %1484  ;;  %1510 = vpow2.f32 %v227_v12  ;;  %v259_v20 = vmul.f32 1.442695, %v1483_v13 }
  0x3d   :  { %v1487_v21 = vpop.eup %1486  ;;  %1512 = vpow2.f32 %v261_v16  ;;  %v233_v26 = vmul.f32 1.442695, %v1485_v17 }
  0x3e   :  { %v1489_v22 = vpop.eup %1488  ;;  %295 = vadd.xlane.f32.xlu1 %v294_v15  ;;  %1514 = vpow2.f32 %v259_v20  ;;  %v231_v30 = vmul.f32 1.442695, %v1487_v21 }
  0x3f   :  { %v1491_v23 = vpop.eup %1490  ;;  %292 = vadd.xlane.f32.xlu0 %v291_v18  ;;  %1516 = vpow2.f32 %v233_v26  ;;  %v265_v34 = vmul.f32 1.442695, %v1489_v22 }
  0x40   :  { %v1493_v27 = vpop.eup %1492  ;;  %1518 = vpow2.f32 %v231_v30  ;;  %v263_v37 = vmul.f32 1.442695, %v1491_v23 }
  0x41   :  { %v1495_v31 = vpop.eup %1494  ;;  %1520 = vpow2.f32 %v265_v34  ;;  %v237_v47 = vmul.f32 1.442695, %v1493_v27  ;;  %v79_v34 = vld [vmem:[%s2564_s2] sm:$0xff] }
  0x42   :  { %v1497_v32 = vpop.eup %1496  ;;  %343 = vadd.xlane.f32.xlu1 %v342_v25  ;;  %1522 = vpow2.f32 %v263_v37  ;;  %v235_v52 = vmul.f32 1.442695, %v1495_v31 }
  0x43   :  { %v1499_v33 = vpop.eup %1498  ;;  %340 = vadd.xlane.f32.xlu0 %v339_v28  ;;  %1524 = vpow2.f32 %v237_v47  ;;  %v269_v58 = vmul.f32 1.442695, %v1497_v32 }
  0x44   :  { %v1966_v36 = vpop.eup %1500  ;;  %1526 = vpow2.f32 %v235_v52  ;;  %v267_v62 = vmul.f32 1.442695, %v1499_v33 }
  0x45   :  { %v1968_v38 = vpop.eup %1502  ;;  %v300_v40 = vsel %vm275_vm1, %v1966_v36, 0.0  ;;  %1528 = vpow2.f32 %v269_v58 }
  0x46   :  { %v1972_v41 = vpop.eup %1504  ;;  %301 = vadd.xlane.f32.xlu1 %v300_v40  ;;  %v297_v43 = vsel %vm271_vm0, %v1968_v38, 0.0  ;;  %1530 = vpow2.f32 %v267_v62 }
  0x47   :  { %v1976_v44 = vpop.eup %1506  ;;  %298 = vadd.xlane.f32.xlu0 %v297_v43  ;;  %v348_v46 = vsel %vm275_vm1, %v1972_v41, 0.0 }
  0x48   :  { %v1980_v49 = vpop.eup %1508  ;;  %v345_v50 = vsel %vm271_vm0, %v1976_v44, 0.0 }
  0x49   :  { %v1984_v54 = vpop.eup %1510  ;;  %v306_v56 = vsel %vm275_vm1, %v1980_v49, 0.0 }
  0x4a   :  { %349 = vadd.xlane.f32.xlu1 %v348_v46  ;;  %v1988_v59 = vpop.eup %1512  ;;  %v303_v60 = vsel %vm271_vm0, %v1984_v54, 0.0  ;;  %v81_v46 = vld [vmem:[%s2564_s2 + $0x10] sm:$0xff] }
  0x4b   :  { %346 = vadd.xlane.f32.xlu0 %v345_v50  ;;  %v1992_v63 = vpop.eup %1514  ;;  %v354_v0 = vsel %vm275_vm1, %v1988_v59, 0.0 }
  0x4c   :  { %v1996_v1 = vpop.eup %1516  ;;  %v351_v2 = vsel %vm271_vm0, %v1992_v63, 0.0 }
  0x4d   :  { %v2000_v4 = vpop.eup %1518  ;;  %v312_v5 = vsel %vm275_vm1, %v1996_v1, 0.0 }
  0x4e   :  { %307 = vadd.xlane.f32.xlu1 %v306_v56  ;;  %v2004_v6 = vpop.eup %1520  ;;  %v309_v7 = vsel %vm271_vm0, %v2000_v4, 0.0  ;;  %v82_v56 = vld [vmem:[%s2564_s2 + $0x18] sm:$0x3] }
  0x4f   :  { %304 = vadd.xlane.f32.xlu0 %v303_v60  ;;  %v2008_v9 = vpop.eup %1522  ;;  %v360_v10 = vsel %vm275_vm1, %v2004_v6, 0.0 }
  0x50   :  { %v2012_v11 = vpop.eup %1524  ;;  %v357_v12 = vsel %vm271_vm0, %v2008_v9, 0.0 }
  0x51   :  { %v2016_v13 = vpop.eup %1526  ;;  %v318_v15 = vsel %vm275_vm1, %v2012_v11, 0.0 }
  0x52   :  { %355 = vadd.xlane.f32.xlu1 %v354_v0  ;;  %v2020_v16 = vpop.eup %1528  ;;  %v315_v17 = vsel %vm271_vm0, %v2016_v13, 0.0 }
  0x53   :  { %352 = vadd.xlane.f32.xlu0 %v351_v2  ;;  %v2024_v18 = vpop.eup %1530  ;;  %v366_v20 = vsel %vm275_vm1, %v2020_v16, 0.0 }
  0x54   :  { %v363_v21 = vsel %vm271_vm0, %v2024_v18, 0.0 }
  0x56   :  { %313 = vadd.xlane.f32.xlu1 %v312_v5 }
  0x57   :  { %310 = vadd.xlane.f32.xlu0 %v309_v7 }
  0x5a   :  { %361 = vadd.xlane.f32.xlu1 %v360_v10 }
  0x5b   :  { %358 = vadd.xlane.f32.xlu0 %v357_v12 }
  0x5e   :  { %319 = vadd.xlane.f32.xlu1 %v318_v15 }
  0x5f   :  { %316 = vadd.xlane.f32.xlu0 %v315_v17 }
  0x62   :  { %367 = vadd.xlane.f32.xlu1 %v366_v20 }
  0x63   :  { %364 = vadd.xlane.f32.xlu0 %v363_v21 }
  0xaf   :  { %v281_v22 = vpop.xlane.xlu1 %280 }
  0xb0   :  { %1532 = vrcp.f32 %v281_v22  ;;  %v274_v23 = vpop.xlane.xlu0 %273 }
  0xb1   :  { %1534 = vrcp.f32 %v274_v23 }
  0xb3   :  { %v284_v25 = vpop.xlane.xlu1 %283 }
  0xb4   :  { %1536 = vrcp.f32 %v284_v25  ;;  %v278_v26 = vpop.xlane.xlu0 %277  ;;  %v95_v25 = vld [vmem:[%s2564_s2 + $0x80] sm:$0xff] }
  0xb5   :  { %1538 = vrcp.f32 %v278_v26 }
  0xb7   :  { %v326_v27 = vpop.xlane.xlu1 %325 }
  0xb8   :  { %1540 = vrcp.f32 %v326_v27  ;;  %v323_v28 = vpop.xlane.xlu0 %322 }
  0xb9   :  { %1542 = vrcp.f32 %v323_v28 }
  0xbb   :  { %v332_v30 = vpop.xlane.xlu1 %331 }
  0xbc   :  { %v329_v31 = vpop.xlane.xlu0 %328  ;;  %1544 = vrcp.f32 %v332_v30 }
  0xbd   :  { %v1533_v32 = vpop.eup %1532  ;;  %1546 = vrcp.f32 %v329_v31 }
  0xbe   :  { %v1535_v33 = vpop.eup %1534  ;;  %v403_v37 = vmul.f32 %v1533_v32, %v1854_v57  ;;  %v80_v57 = vld [vmem:[%s2564_s2 + $0x8] sm:$0x3] }
  0xbf   :  { %v290_v40 = vpop.xlane.xlu1 %289  ;;  %v401_v43 = vmul.f32 %v1535_v33, %v1862_v61 }
  0xc0   :  { %1548 = vrcp.f32 %v290_v40  ;;  %v287_v47 = vpop.xlane.xlu0 %286  ;;  %v435_v60 = vmul.f32 %v403_v37, %v81_v46 }
  0xc1   :  { %v1537_v50 = vpop.eup %1536  ;;  %1550 = vrcp.f32 %v287_v47  ;;  %v433_v52 = vmul.f32 %v401_v43, %v79_v34 }
  0xc2   :  { %v1539_v58 = vpop.eup %1538  ;;  %v404_v61 = vmul.f32 %v1537_v50, %v1872_v3  ;;  %v474_v17 = vsel %vm271_vm0, %v435_v60, 0.0  ;;  %v96_v3 = vld [vmem:[%s2564_s2 + $0x88] sm:$0x3] }
  0xc3   :  { %v338_v62 = vpop.xlane.xlu1 %337  ;;  %v465_v0 = vsel %vm271_vm0, %v433_v52, 0.0  ;;  %v402_v2 = vmul.f32 %v1539_v58, %v1882_v8  ;;  %v83_v52 = vld [vmem:[%s2564_s2 + $0x20] sm:$0xff] }
  0xc4   :  { %609 = vadd.xlane.f32.xlu0 %v465_v0  ;;  %v335_v5 = vpop.xlane.xlu0 %334  ;;  %v436_v7 = vmul.f32 %v404_v61, %v82_v56  ;;  %1552 = vrcp.f32 %v338_v62  ;;  %v98_v61 = vld [vmem:[%s2564_s2 + $0x98] sm:$0x3] }
  0xc5   :  { %v1541_v10 = vpop.eup %1540  ;;  %v434_v12 = vmul.f32 %v402_v2, %v80_v57  ;;  %1554 = vrcp.f32 %v335_v5  ;;  %v97_v5 = vld [vmem:[%s2564_s2 + $0x90] sm:$0xff] }
  0xc6   :  { %v1543_v15 = vpop.eup %1542  ;;  %v475_v20 = vsel %vm275_vm1, %v436_v7, 0.0  ;;  %v418_v21 = vmul.f32 %v1541_v10, %v1892_v14 }
  0xc7   :  { %v296_v22 = vpop.xlane.xlu1 %295  ;;  %v466_v8 = vsel %vm275_vm1, %v434_v12, 0.0  ;;  %v476_v23 = vadd.f32 %v475_v20, %v474_v17  ;;  %v417_v26 = vmul.f32 %v1543_v15, %v1902_v19  ;;  %v84_v19 = vld [vmem:[%s2564_s2 + $0x28] sm:$0x3] }
  0xc8   :  { %1556 = vrcp.f32 %v296_v22  ;;  %613 = vadd.xlane.f32.xlu0 %v474_v17  ;;  %611 = vadd.xlane.f32.xlu1 %v466_v8  ;;  %v293_v27 = vpop.xlane.xlu0 %292  ;;  %v450_v28 = vmul.f32 %v418_v21, %v96_v3  ;;  %v467_v34 = vadd.f32 %v466_v8, %v465_v0 }
  0xc9   :  { %1558 = vrcp.f32 %v293_v27  ;;  %v477_v30 = vrot.slane %v476_v23, 4  ;;  %v449_v31 = vmul.f32 %v417_v26, %v95_v25  ;;  %v1545_v14 = vpop.eup %1544  ;;  %v86_v25 = vld [vmem:[%s2564_s2 + $0x38] sm:$0x3] }
  0xca   :  { %v1547_v33 = vpop.eup %1546  ;;  %v2062_v43 = vsel %vm275_vm1, %v450_v28, 0.0  ;;  %v420_v58 = vmul.f32 %v1545_v14, %v1910_v24  ;;  %v468_v0 = vrot.slane %v467_v34, 4 }
  0xcb   :  { %v344_v32 = vpop.xlane.xlu1 %343  ;;  %v478_v47 = vadd.f32 %v477_v30, %v476_v23  ;;  %v2069_v56 = vsel %vm271_vm0, %v449_v31, 0.0  ;;  %v419_v62 = vmul.f32 %v1547_v33, %v1918_v29  ;;  %v85_v31 = vld [vmem:[%s2564_s2 + $0x30] sm:$0xff] }
  0xcc   :  { %1560 = vrcp.f32 %v344_v32  ;;  %615 = vadd.xlane.f32.xlu1 %v475_v20  ;;  %v341_v37 = vpop.xlane.xlu0 %340  ;;  %v539_v24 = vadd.f32 %v2062_v43, %v2069_v56  ;;  %v452_v12 = vmul.f32 %v420_v58, %v98_v61  ;;  %v469_v21 = vadd.f32 %v468_v0, %v467_v34 }
  0xcd   :  { %v1549_v40 = vpop.eup %1548  ;;  %1562 = vrcp.f32 %v341_v37  ;;  %v451_v20 = vmul.f32 %v419_v62, %v97_v5 }
  0xce   :  { %v1551_v46 = vpop.eup %1550  ;;  %v406_v50 = vmul.f32 %v1549_v40, %v1928_v35  ;;  %v540_v26 = vrot.slane %v539_v24, 4  ;;  %v2092_v14 = vsel %vm275_vm1, %v452_v12, 0.0  ;;  %v88_v12 = vld [vmem:[%s2564_s2 + $0x48] sm:$0x3] }
  0xcf   :  { %v302_v60 = vpop.xlane.xlu1 %301  ;;  %v405_v57 = vmul.f32 %v1551_v46, %v1932_v39  ;;  %v479_v39 = vrot.slane %v478_v47, 2  ;;  %v2096_v34 = vsel %vm271_vm0, %v451_v20, 0.0 }
  0xd0   :  { %1564 = vrcp.f32 %v302_v60  ;;  %v299_v35 = vpop.xlane.xlu0 %298  ;;  %v438_v2 = vmul.f32 %v406_v50, %v84_v19  ;;  %v470_v19 = vrot.slane %v469_v21, 2  ;;  %v100_v50 = vld [vmem:[%s2564_s2 + $0xa8] sm:$0x3]  ;;  %v541_v60 = vadd.f32 %v540_v26, %v539_v24 }
  0xd1   :  { %1566 = vrcp.f32 %v299_v35  ;;  %v437_v7 = vmul.f32 %v405_v57, %v83_v52  ;;  %v1553_v15 = vpop.eup %1552  ;;  %v480_v28 = vadd.f32 %v479_v39, %v478_v47  ;;  %v548_v61 = vadd.f32 %v2092_v14, %v2096_v34 }
  0xd2   :  { %v484_v10 = vsel %vm275_vm1, %v438_v2, 0.0  ;;  %v1555_v3 = vpop.eup %1554  ;;  %v422_v37 = vmul.f32 %v1553_v15, %v1934_v42  ;;  %v471_v5 = vadd.f32 %v470_v19, %v469_v21  ;;  %v542_v15 = vrot.slane %v541_v60, 2 }
  0xd3   :  { %v350_v17 = vpop.xlane.xlu1 %349  ;;  %619 = vadd.xlane.f32.xlu1 %v484_v10  ;;  %v483_v29 = vsel %vm271_vm0, %v437_v7, 0.0  ;;  %v421_v40 = vmul.f32 %v1555_v3, %v1936_v45  ;;  %v481_v57 = vrot.slane %v480_v28, 1 }
  0xd4   :  { %617 = vadd.xlane.f32.xlu0 %v483_v29  ;;  %v485_v22 = vadd.f32 %v484_v10, %v483_v29  ;;  %v347_v8 = vpop.xlane.xlu0 %346  ;;  %1568 = vrcp.f32 %v350_v17  ;;  %v454_v35 = vmul.f32 %v422_v37, %v100_v50 }
  0xd5   :  { %v1557_v23 = vpop.eup %1556  ;;  %v482_v3 = vadd.f32 %v481_v57, %v480_v28  ;;  %v472_v28 = vrot.slane %v471_v5, 1 }
  0xd6   :  { %v1559_v27 = vpop.eup %1558  ;;  %v408_v30 = vmul.f32 %v1557_v23, %v1940_v48  ;;  %v486_v48 = vrot.slane %v485_v22, 4 }
  0xd7   :  { %v308_v32 = vpop.xlane.xlu1 %307  ;;  %v407_v33 = vmul.f32 %v1559_v27, %v1944_v51  ;;  %v99_v51 = vld [vmem:[%s2564_s2 + $0xa0] sm:$0xff]  ;;  %v2127_v27 = vsel %vm275_vm1, %v454_v35, 0.0 }
  0xd8   :  { %v305_v46 = vpop.xlane.xlu0 %304  ;;  %v440_v47 = vmul.f32 %v408_v30, %v86_v25  ;;  %1570 = vrcp.f32 %v308_v32  ;;  %v453_v2 = vmul.f32 %v421_v40, %v99_v51  ;;  %v487_v7 = vadd.f32 %v486_v48, %v485_v22  ;;  %v87_v22 = vld [vmem:[%s2564_s2 + $0x40] sm:$0xff] }
  0xd9   :  { %v1561_v52 = vpop.eup %1560  ;;  %v439_v58 = vmul.f32 %v407_v33, %v85_v31  ;;  %1572 = vrcp.f32 %v305_v46  ;;  %v549_v25 = vrot.slane %v548_v61, 4  ;;  %v543_v46 = vadd.f32 %v542_v15, %v541_v60 }
  0xda   :  { %v1563_v42 = vpop.eup %1562  ;;  %v493_v45 = vsel %vm275_vm1, %v440_v47, 0.0  ;;  %1574 = vrcp.f32 %v347_v8  ;;  %v424_v17 = vmul.f32 %v1561_v52, %v1946_v53  ;;  %v102_v8 = vld [vmem:[%s2564_s2 + $0xb8] sm:$0x3]  ;;  %v101_v53 = vld [vmem:[%s2564_s2 + $0xb0] sm:$0xff]  ;;  %v488_v30 = vrot.slane %v487_v7, 2 }
  0xdb   :  { %v356_v62 = vpop.xlane.xlu1 %355  ;;  %623 = vadd.xlane.f32.xlu1 %v493_v45  ;;  %v492_v0 = vsel %vm271_vm0, %v439_v58, 0.0  ;;  %v423_v29 = vmul.f32 %v1563_v42, %v1948_v55  ;;  %v674_v47 = vmul.f32 %v482_v3, %v482_v3  ;;  %v550_v52 = vadd.f32 %v549_v25, %v548_v61 }
  0xdc   :  { %621 = vadd.xlane.f32.xlu0 %v492_v0  ;;  %v494_v39 = vadd.f32 %v493_v45, %v492_v0  ;;  %v353_v10 = vpop.xlane.xlu0 %352  ;;  %1576 = vrcp.f32 %v356_v62  ;;  %v456_v37 = vmul.f32 %v424_v17, %v102_v8  ;;  %v489_v58 = vadd.f32 %v488_v30, %v487_v7 }
  0xdd   :  { %v1565_v24 = vpop.eup %1564  ;;  %v455_v40 = vmul.f32 %v423_v29, %v101_v53  ;;  %v473_v62 = vadd.f32 %v472_v28, %v471_v5  ;;  %v544_v61 = vrot.slane %v543_v46, 1  ;;  %v551_v17 = vrot.slane %v550_v52, 2 }
  0xde   :  { %v1567_v20 = vpop.eup %1566  ;;  %v495_v23 = vrot.slane %v494_v39, 4  ;;  %v410_v21 = vmul.f32 %v1565_v24, %v1966_v36  ;;  %v2130_v36 = vsel %vm271_vm0, %v453_v2, 0.0  ;;  %v2137_v0 = vsel %vm275_vm1, %v456_v37, 0.0 }
  0xdf   :  { %v314_v55 = vpop.xlane.xlu1 %313  ;;  %v409_v26 = vmul.f32 %v1567_v20, %v1968_v38  ;;  %v557_v38 = vadd.f32 %v2127_v27, %v2130_v36  ;;  %v2140_v60 = vsel %vm271_vm0, %v455_v40, 0.0  ;;  %v490_v29 = vrot.slane %v489_v58, 1 }
  0xe0   :  { %1578 = vrcp.f32 %v314_v55  ;;  %v311_v31 = vpop.xlane.xlu0 %310  ;;  %v442_v32 = vmul.f32 %v410_v21, %v88_v12  ;;  %v496_v19 = vadd.f32 %v495_v23, %v494_v39  ;;  %v90_v39 = vld [vmem:[%s2564_s2 + $0x58] sm:$0x3]  ;;  %v566_v23 = vadd.f32 %v2137_v0, %v2140_v60 }
  0xe1   :  { %1580 = vrcp.f32 %v311_v31  ;;  %v441_v33 = vmul.f32 %v409_v26, %v87_v22  ;;  %v1569_v45 = vpop.eup %1568  ;;  %v558_v7 = vrot.slane %v557_v38, 4  ;;  %v673_v21 = vmul.f32 %v473_v62, %v473_v62  ;;  %v104_v26 = vld [vmem:[%s2564_s2 + $0xc8] sm:$0x3] }
  0xe2   :  { %v502_v48 = vsel %vm275_vm1, %v442_v32, 0.0  ;;  %1582 = vrcp.f32 %v353_v10  ;;  %v497_v2 = vrot.slane %v496_v19, 2  ;;  %v89_v10 = vld [vmem:[%s2564_s2 + $0x50] sm:$0xff]  ;;  %v426_v25 = vmul.f32 %v1569_v45, %v1972_v41  ;;  %v103_v45 = vld [vmem:[%s2564_s2 + $0xc0] sm:$0xff] }
  0xe3   :  { %v362_v50 = vpop.xlane.xlu1 %361  ;;  %627 = vadd.xlane.f32.xlu1 %v502_v48  ;;  %v501_v51 = vsel %vm271_vm0, %v441_v33, 0.0  ;;  %1584 = vtanh.f32 %v674_v47  ;;  %v559_v55 = vadd.f32 %v558_v7, %v557_v38  ;;  %v552_v31 = vadd.f32 %v551_v17, %v550_v52  ;;  %v92_v47 = vld [vmem:[%s2564_s2 + $0x68] sm:$0x3] }
  0xe4   :  { %625 = vadd.xlane.f32.xlu0 %v501_v51  ;;  %v503_v42 = vadd.f32 %v502_v48, %v501_v51  ;;  %v359_v57 = vpop.xlane.xlu0 %358  ;;  %v491_v33 = vadd.f32 %v490_v29, %v489_v58  ;;  %v545_v40 = vadd.f32 %v544_v61, %v543_v46  ;;  %v91_v46 = vld [vmem:[%s2564_s2 + $0x60] sm:$0xff] }
  0xe5   :  { %v1571_v35 = vpop.eup %1570  ;;  %1586 = vrcp.f32 %v359_v57  ;;  %v560_v57 = vrot.slane %v559_v55, 2 }
  0xe6   :  { %v1573_v24 = vpop.eup %1572  ;;  %v504_v12 = vrot.slane %v503_v42, 4  ;;  %v412_v5 = vmul.f32 %v1571_v35, %v1980_v49  ;;  %v498_v49 = vadd.f32 %v497_v2, %v496_v19  ;;  %v567_v19 = vrot.slane %v566_v23, 4 }
  0xe7   :  { %v320_v15 = vpop.xlane.xlu1 %319  ;;  %v411_v3 = vmul.f32 %v1573_v24, %v1984_v54  ;;  %v1575_v8 = vpop.eup %1574 }
  0xe8   :  { %v317_v20 = vpop.xlane.xlu0 %316  ;;  %1588 = vrcp.f32 %v320_v15  ;;  %v444_v22 = vmul.f32 %v412_v5, %v90_v39  ;;  %v505_v28 = vadd.f32 %v504_v12, %v503_v42  ;;  %v425_v51 = vmul.f32 %v1575_v8, %v1976_v44 }
  0xe9   :  { %1590 = vrcp.f32 %v317_v20  ;;  %v443_v53 = vmul.f32 %v411_v3, %v89_v10  ;;  %v1577_v32 = vpop.eup %1576  ;;  %v499_v42 = vrot.slane %v498_v49, 1  ;;  %v553_v39 = vrot.slane %v552_v31, 1  ;;  %v106_v10 = vld [vmem:[%s2564_s2 + $0xd8] sm:$0x3] }
  0xea   :  { %1592 = vrcp.f32 %v362_v50  ;;  %v511_v30 = vsel %vm275_vm1, %v444_v22, 0.0  ;;  %v458_v50 = vmul.f32 %v426_v25, %v104_v26  ;;  %v506_v62 = vrot.slane %v505_v28, 2 }
  0xeb   :  { %v368_v54 = vpop.xlane.xlu1 %367  ;;  %631 = vadd.xlane.f32.xlu1 %v511_v30  ;;  %v510_v41 = vsel %vm271_vm0, %v443_v53, 0.0  ;;  %v675_v44 = vmul.f32 %v491_v33, %v491_v33  ;;  %v568_v7 = vadd.f32 %v567_v19, %v566_v23  ;;  %v428_v24 = vmul.f32 %v1577_v32, %v1988_v59 }
  0xec   :  { %v365_v37 = vpop.xlane.xlu0 %364  ;;  %1594 = vrcp.f32 %v368_v54  ;;  %629 = vadd.xlane.f32.xlu0 %v510_v41  ;;  %v512_v38 = vadd.f32 %v511_v30, %v510_v41  ;;  %v2172_v15 = vsel %vm275_vm1, %v458_v50, 0.0  ;;  %v457_v5 = vmul.f32 %v425_v51, %v103_v45 }
  0xed   :  { %v1579_v48 = vpop.eup %1578  ;;  %1596 = vrcp.f32 %v365_v37  ;;  %v500_v29 = vadd.f32 %v499_v42, %v498_v49  ;;  %v2178_v20 = vadd.f32 %v560_v57, %v559_v55  ;;  %v507_v3 = vadd.f32 %v506_v62, %v505_v28  ;;  %v105_v55 = vld [vmem:[%s2564_s2 + $0xd0] sm:$0xff]  ;;  %v94_v37 = vld [vmem:[%s2564_s2 + $0x78] sm:$0x3] }
  0xee   :  { %v1581_v52 = vpop.eup %1580  ;;  %v414_v58 = vmul.f32 %v1579_v48, %v1996_v1  ;;  %v513_v35 = vrot.slane %v512_v38, 4  ;;  %1598 = vtanh.f32 %v673_v21  ;;  %v2182_v22 = vsel %vm271_vm0, %v457_v5, 0.0 }
  0xef   :  { %v413_v2 = vmul.f32 %v1581_v52, %v2000_v4  ;;  %v1583_v17 = vpop.eup %1582  ;;  %v2186_v53 = vmul.f32 %v545_v40, %v545_v40  ;;  %v575_v21 = vadd.f32 %v2172_v15, %v2182_v22  ;;  %v460_v49 = vmul.f32 %v428_v24, %v106_v10  ;;  %v107_v24 = vld [vmem:[%s2564_s2 + $0xe0] sm:$0xff] }
  0xf0   :  { %v446_v61 = vmul.f32 %v414_v58, %v92_v47  ;;  %v514_v1 = vadd.f32 %v513_v35, %v512_v38  ;;  %v2184_v25 = vpop.eup %1584  ;;  %1600 = vtanh.f32 %v675_v44  ;;  %v2193_v28 = vadd.f32 %v553_v39, %v552_v31 }
  0xf1   :  { %v445_v12 = vmul.f32 %v413_v2, %v91_v46  ;;  %v569_v54 = vrot.slane %v568_v7, 2  ;;  %v427_v30 = vmul.f32 %v1583_v17, %v1992_v63  ;;  %v562_v40 = vrot.slane %v2178_v20, 1  ;;  %v93_v63 = vld [vmem:[%s2564_s2 + $0x70] sm:$0xff]  ;;  %v110_v2 = vld [vmem:[%s2564_s2 + $0xf8] sm:$0x3] }
  0xf2   :  { %v520_v4 = vsel %vm275_vm1, %v446_v61, 0.0  ;;  %v515_v23 = vrot.slane %v514_v1, 2  ;;  %v1587_v26 = vpop.eup %1586  ;;  %v576_v19 = vrot.slane %v575_v21, 4  ;;  %v2200_v38 = vmul.f32 %v500_v29, %v500_v29 }
  0xf3   :  { %635 = vadd.xlane.f32.xlu1 %v520_v4  ;;  %v519_v59 = vsel %vm271_vm0, %v445_v12, 0.0  ;;  %v508_v47 = vrot.slane %v507_v3, 1  ;;  %v459_v50 = vmul.f32 %v427_v30, %v105_v55  ;;  %v2208_v46 = vsel %vm275_vm1, %v460_v49, 0.0 }
  0xf4   :  { %633 = vadd.xlane.f32.xlu0 %v519_v59  ;;  %v521_v8 = vadd.f32 %v520_v4, %v519_v59  ;;  %v516_v33 = vadd.f32 %v515_v23, %v514_v1  ;;  %v577_v58 = vadd.f32 %v576_v19, %v575_v21  ;;  %v570_v45 = vadd.f32 %v569_v54, %v568_v7 }
  0xf5   :  { %v1589_v32 = vpop.eup %1588  ;;  %v2211_v62 = vsel %vm271_vm0, %v459_v50, 0.0  ;;  %v509_v17 = vadd.f32 %v508_v47, %v507_v3  ;;  %1602 = vtanh.f32 %v2200_v38 }
  0xf6   :  { %v522_v41 = vrot.slane %v521_v8, 4  ;;  %v1591_v48 = vpop.eup %1590  ;;  %v416_v31 = vmul.f32 %v1589_v32, %v2012_v11  ;;  %v429_v11 = vmul.f32 %v1587_v26, %v2008_v9  ;;  %v517_v39 = vrot.slane %v516_v33, 1  ;;  %v109_v9 = vld [vmem:[%s2564_s2 + $0xf0] sm:$0xff] }
  0xf7   :  { %v1593_v51 = vpop.eup %1592  ;;  %v415_v42 = vmul.f32 %v1591_v48, %v2016_v13  ;;  %v578_v13 = vrot.slane %v577_v58, 2  ;;  %v584_v5 = vadd.f32 %v2208_v46, %v2211_v62  ;;  %v571_v32 = vrot.slane %v570_v45, 1 }
  0xf8   :  { %v523_v52 = vadd.f32 %v522_v41, %v521_v8  ;;  %v448_v57 = vmul.f32 %v416_v31, %v94_v37  ;;  %v430_v10 = vmul.f32 %v1593_v51, %v2004_v6  ;;  %v461_v49 = vmul.f32 %v429_v11, %v107_v24 }
  0xf9   :  { %v1595_v35 = vpop.eup %1594  ;;  %v447_v61 = vmul.f32 %v415_v42, %v93_v63  ;;  %v579_v21 = vadd.f32 %v578_v13, %v577_v58  ;;  %v518_v55 = vadd.f32 %v517_v39, %v516_v33  ;;  %v585_v6 = vrot.slane %v584_v5, 4 }
  0xfa   :  { %v524_v44 = vrot.slane %v523_v52, 2  ;;  %v1597_v1 = vpop.eup %1596  ;;  %v432_v7 = vmul.f32 %v1595_v35, %v2020_v16  ;;  %v529_v12 = vsel %vm275_vm1, %v448_v57, 0.0  ;;  %v108_v16 = vld [vmem:[%s2564_s2 + $0xe8] sm:$0x3]  ;;  %v677_v33 = vmul.f32 %v509_v17, %v509_v17  ;;  %s1687_s2 = smov [#allocation2]  }
  0xfb   :  { %v431_v29 = vmul.f32 %v1597_v1, %v2024_v18  ;;  %639 = vadd.xlane.f32.xlu1 %v529_v12  ;;  %v528_v23 = vsel %vm271_vm0, %v447_v61, 0.0  ;;  %v2233_v3 = vpop.eup %1598  ;;  %v462_v41 = vmul.f32 %v430_v10, %v108_v16  ;;  %v580_v48 = vrot.slane %v579_v21, 1  ;;  %s1387_s9 = sshll.u32 %s1687_s2, 4  ;;  %s1388_s9 = int_to_ptr.vmem [resolvable:$true] %s1387_s9 }
  0xfc   :  { %v525_v4 = vadd.f32 %v524_v44, %v523_v52  ;;  %v464_v59 = vmul.f32 %v432_v7, %v110_v2  ;;  %637 = vadd.xlane.f32.xlu0 %v528_v23  ;;  %v530_v8 = vadd.f32 %v529_v12, %v528_v23  ;;  %v586_v47 = vadd.f32 %v585_v6, %v584_v5  ;;  %s1664_s10 = scalar_lea.vmem %s1388_s9, 256  ;;  %p1669_p1 = scmp.lt.s32.totalorder %s1388_s9, %s1388_s9 }
  0xfd   :  { %v463_v26 = vmul.f32 %v431_v29, %v109_v9  ;;  %v2246_v50 = vsel %vm271_vm0, %v461_v49, 0.0  ;;  %v1601_v51 = vpop.eup %1600  ;;  %v678_v52 = vmul.f32 %v518_v55, %v518_v55  ;;  %v563_v42 = vadd.f32 %v562_v40, %v2178_v20  ;;  %p1665_p0 = scmp.ne.s32.totalorder %s1388_s9, %s1664_s10  ;;  %p1670_p2 = scmp.lt.s32.totalorder %s1664_s10, %s1664_s10 }
  0xfe   :  { %v526_v54 = vrot.slane %v525_v4, 1  ;;  %v2236_v18 = vsel %vm275_vm1, %v464_v59, 0.0  ;;  %v531_v30 = vrot.slane %v530_v8, 4  ;;  %v587_v58 = vrot.slane %v586_v47, 2 }
  0xff   :  { %v2239_v37 = vsel %vm271_vm0, %v463_v26, 0.0  ;;  %643 = vadd.xlane.f32.xlu1 %v2062_v43  ;;  %v2250_v57 = vsel %vm275_vm1, %v462_v41, 0.0  ;;  %v572_v2 = vadd.f32 %v571_v32, %v570_v45  ;;  %1604 = vtanh.f32 %v677_v33  ;;  %p1671_p3 = por %p1670_p2, %p1669_p1 }
 0x100   :  { %v527_v19 = vadd.f32 %v526_v54, %v525_v4  ;;  %v602_v31 = vadd.f32 %v2236_v18, %v2239_v37  ;;  %v532_v63 = vadd.f32 %v531_v30, %v530_v8  ;;  %641 = vadd.xlane.f32.xlu0 %v2069_v56  ;;  %v581_v56 = vadd.f32 %v580_v48, %v579_v21 }
 0x101   :  { %v588_v39 = vadd.f32 %v587_v58, %v586_v47  ;;  %v593_v44 = vadd.f32 %v2250_v57, %v2246_v50  ;;  %v682_v40 = vmul.f32 %v2193_v28, %v2193_v28  ;;  %1606 = vtanh.f32 %v678_v52  ;;  %p1672_p4 = pnand %p1671_p3, %p1665_p0 }
 0x102   :  { %v603_v43 = vrot.slane %v602_v31, 4  ;;  %v679_v11 = vmul.f32 %v527_v19, %v527_v19  ;;  %v533_v35 = vrot.slane %v532_v63, 2  ;;  %v683_v13 = vmul.f32 %v563_v42, %v563_v42  ;;  %v1603_v59 = vpop.eup %1602 }
 0x103   :  { %647 = vadd.xlane.f32.xlu1 %v2092_v14  ;;  %v589_v45 = vrot.slane %v588_v39, 1  ;;  %v594_v24 = vrot.slane %v593_v44, 4  ;;  %v684_v1 = vmul.f32 %v572_v2, %v572_v2  ;;  %v685_v7 = vmul.f32 %v581_v56, %v581_v56 }
 0x104   :  { %v604_v61 = vadd.f32 %v603_v43, %v602_v31  ;;  %v534_v20 = vadd.f32 %v533_v35, %v532_v63  ;;  %645 = vadd.xlane.f32.xlu0 %v2096_v34  ;;  %1608 = vtanh.f32 %v679_v11  ;;  %v707_v16 = vmul.f32 1.442695, %v2184_v25 }
 0x105   :  { %1610 = vtanh.f32 %v2186_v53  ;;  %v590_v9 = vadd.f32 %v589_v45, %v588_v39  ;;  %v595_v12 = vadd.f32 %v594_v24, %v593_v44  ;;  %v709_v55 = vmul.f32 1.442695, %v1601_v51 }
 0x106   :  { %v605_v38 = vrot.slane %v604_v61, 2  ;;  %v535_v14 = vrot.slane %v534_v20, 1  ;;  %1612 = vtanh.f32 %v682_v40  ;;  %v711_v26 = vmul.f32 1.442695, %v1603_v59 }
 0x107   :  { %651 = vadd.xlane.f32.xlu1 %v2127_v27  ;;  %1614 = vtanh.f32 %v683_v13  ;;  %v686_v34 = vmul.f32 %v590_v9, %v590_v9  ;;  %v596_v28 = vrot.slane %v595_v12, 2 }
 0x108   :  { %v606_v5 = vadd.f32 %v605_v38, %v604_v61  ;;  %v536_v10 = vadd.f32 %v535_v14, %v534_v20  ;;  %649 = vadd.xlane.f32.xlu0 %v2130_v36  ;;  %1616 = vtanh.f32 %v684_v1 }
 0x109   :  { %1618 = vtanh.f32 %v685_v7  ;;  %v597_v53 = vadd.f32 %v596_v28, %v595_v12 }
 0x10a   :  { %v607_v17 = vrot.slane %v606_v5, 1  ;;  %v680_v29 = vmul.f32 %v536_v10, %v536_v10  ;;  %1620 = vtanh.f32 %v686_v34 }
 0x10b   :  { %655 = vadd.xlane.f32.xlu1 %v2137_v0  ;;  %v598_v27 = vrot.slane %v597_v53, 1  ;;  %v705_v0 = vmul.f32 1.442695, %v2233_v3 }
 0x10c   :  { %v608_v4 = vadd.f32 %v607_v17, %v606_v5  ;;  %653 = vadd.xlane.f32.xlu0 %v2140_v60  ;;  %1622 = vtanh.f32 %v680_v29  ;;  %v1605_v8 = vpop.eup %1604 }
 0x10d   :  { %v599_v36 = vadd.f32 %v598_v27, %v597_v53  ;;  %v713_v25 = vmul.f32 1.442695, %v1605_v8 }
 0x10e   :  { %v688_v23 = vmul.f32 %v608_v4, %v608_v4  ;;  %v1607_v49 = vpop.eup %1606 }
 0x10f   :  { %659 = vadd.xlane.f32.xlu1 %v2172_v15  ;;  %v687_v21 = vmul.f32 %v599_v36, %v599_v36  ;;  %v715_v6 = vmul.f32 1.442695, %v1607_v49 }
 0x110   :  { %1624 = vtanh.f32 %v688_v23  ;;  %657 = vadd.xlane.f32.xlu0 %v2182_v22 }
 0x111   :  { %v1609_v60 = vpop.eup %1608  ;;  %1626 = vpow2.f32 %v707_v16 }
 0x112   :  { %v1611_v54 = vpop.eup %1610  ;;  %1628 = vtanh.f32 %v687_v21  ;;  %v717_v30 = vmul.f32 1.442695, %v1609_v60 }
 0x113   :  { %663 = vadd.xlane.f32.xlu1 %v2208_v46  ;;  %v1613_v15 = vpop.eup %1612  ;;  %1630 = vpow2.f32 %v705_v0  ;;  %v721_v32 = vmul.f32 1.442695, %v1611_v54 }
 0x114   :  { %661 = vadd.xlane.f32.xlu0 %v2211_v62  ;;  %v1615_v22 = vpop.eup %1614  ;;  %1632 = vpow2.f32 %v709_v55  ;;  %v723_v19 = vmul.f32 1.442695, %v1613_v15 }
 0x115   :  { %v1617_v3 = vpop.eup %1616  ;;  %1634 = vpow2.f32 %v711_v26  ;;  %v725_v47 = vmul.f32 1.442695, %v1615_v22 }
 0x116   :  { %v1619_v41 = vpop.eup %1618  ;;  %1636 = vpow2.f32 %v713_v25  ;;  %v727_v62 = vmul.f32 1.442695, %v1617_v3 }
 0x117   :  { %v1621_v48 = vpop.eup %1620  ;;  %1638 = vpow2.f32 %v715_v6  ;;  %v729_v31 = vmul.f32 1.442695, %v1619_v41 }
 0x118   :  { %1640 = vpow2.f32 %v717_v30  ;;  %v731_v51 = vmul.f32 1.442695, %v1621_v48 }
 0x119   :  { %v1623_v46 = vpop.eup %1622  ;;  %1642 = vpow2.f32 %v721_v32 }
 0x11a   :  { %v719_v33 = vmul.f32 1.442695, %v1623_v46  ;;  %1644 = vpow2.f32 %v723_v19 }
 0x11c   :  { %1646 = vpow2.f32 %v719_v33 }
 0x11d   :  { %v1625_v63 = vpop.eup %1624  ;;  %1648 = vpow2.f32 %v725_v47 }
 0x11e   :  { %v735_v52 = vmul.f32 1.442695, %v1625_v63  ;;  %1650 = vpow2.f32 %v727_v62  ;;  %v2270_v42 = vpop.eup %1626 }
 0x11f   :  { %1652 = vpow2.f32 %v729_v31  ;;  %v1629_v58 = vpop.eup %1628 }
 0x120   :  { %1654 = vpow2.f32 %v731_v51  ;;  %v2272_v43 = vpop.eup %1630  ;;  %v733_v11 = vmul.f32 1.442695, %v1629_v58  ;;  %v1686_v58 = vmov 0  }
 0x121   :  { %v2274_v35 = vpop.eup %1632  ;;  %1656 = vpow2.f32 %v735_v52  ;;  %v754_v39 = vsel %vm753_vm2, %v2270_v42, %v2272_v43  ;;  %v848_v52 = vlaneseq  ;;  %1403 = vset.pattern.permute.xlu1 %v1686_v58  ;;  %1402 = vset.pattern.permute.xlu0 %v1686_v58 }
 0x122   :  { %v2276_v2 = vpop.eup %1634  ;;  %1658 = vpow2.f32 %v733_v11  ;;  %v756_v61 = vsel %vm755_vm3, %v2274_v35, %v754_v39 }
 0x123   :  { %v2278_v56 = vpop.eup %1636  ;;  %v758_v40 = vsel %vm757_vm4, %v2276_v2, %v756_v61  ;;  %v2395_v39 = vshrl.u32 %v848_v52, 7 }
 0x124   :  { %v2283_v44 = vpop.eup %1638  ;;  %v760_v45 = vsel %vm759_vm5, %v2278_v56, %v758_v40 }
 0x125   :  { %v2287_v20 = vpop.eup %1640  ;;  %v762_v38 = vsel %vm761_vm6, %v2283_v44, %v760_v45  ;;  %v2398_v61 = vsub.s32 0, %v2395_v39 }
 0x126   :  { %v2291_v13 = vpop.eup %1642  ;;  %v764_v1 = vsel %vm763_vm7, %v2287_v20, %v762_v38 }
 0x127   :  { %v2295_v24 = vpop.eup %1644 }
 0x128   :  { %v767_v34 = vsel %vm753_vm2, %v2295_v24, %v2291_v13 }
 0x129   :  { %v2299_v14 = vpop.eup %1646 }
 0x12a   :  { %v2303_v7 = vpop.eup %1648  ;;  %v766_v9 = vsel %vm765_vm8, %v2299_v14, %v764_v1 }
 0x12b   :  { %v2307_v12 = vpop.eup %1650  ;;  %v776_v5 = vsel %vm271_vm0, %v766_v9, 0.0  ;;  %v768_v17 = vsel %vm755_vm3, %v2303_v7, %v767_v34 }
 0x12c   :  { %v2310_v10 = vpop.eup %1652  ;;  %777 = vadd.xlane.f32.xlu1 %v776_v5  ;;  %v769_v29 = vsel %vm757_vm4, %v2307_v12, %v768_v17 }
 0x12d   :  { %v2315_v28 = vpop.eup %1654  ;;  %v770_v4 = vsel %vm759_vm5, %v2310_v10, %v769_v29 }
 0x12e   :  { %v2321_v53 = vpop.eup %1656  ;;  %v771_v23 = vsel %vm761_vm6, %v2315_v28, %v770_v4 }
 0x12f   :  { %v2325_v27 = vpop.eup %1658 }
 0x130   :  { %667 = vadd.xlane.f32.xlu1 %v2250_v57  ;;  %v772_v16 = vsel %vm763_vm7, %v2325_v27, %v771_v23 }
 0x131   :  { %v773_v36 = vsel %vm765_vm8, %v2321_v53, %v772_v16 }
 0x132   :  { %v779_v59 = vsel %vm271_vm0, %v773_v36, 0.0 }
 0x133   :  { %780 = vadd.xlane.f32.xlu0 %v779_v59 }
 0x134   :  { %671 = vadd.xlane.f32.xlu1 %v2236_v18 }
 0x137   :  { %665 = vadd.xlane.f32.xlu0 %v2246_v50 }
 0x13b   :  { %669 = vadd.xlane.f32.xlu0 %v2239_v37 }
 0x14d   :  { %v2342_v0 = vpop.xlane.xlu0 %609 }
 0x151   :  { %v2338_v8 = vpop.xlane.xlu1 %611  ;;  %v2346_v49 = vpop.xlane.xlu0 %613 }
 0x155   :  { %v2340_v57 = vpop.xlane.xlu1 %615 }
 0x15c   :  { %v2344_v21 = vpop.xlane.xlu1 %619 }
 0x15d   :  { %v2350_v60 = vpop.xlane.xlu0 %617 }
 0x164   :  { %v2348_v55 = vpop.xlane.xlu1 %623 }
 0x165   :  { %v2354_v18 = vpop.xlane.xlu0 %621 }
 0x16c   :  { %v2352_v26 = vpop.xlane.xlu1 %627 }
 0x16d   :  { %v2358_v37 = vpop.xlane.xlu0 %625 }
 0x174   :  { %v2356_v50 = vpop.xlane.xlu1 %631 }
 0x175   :  { %v2362_v25 = vpop.xlane.xlu0 %629 }
 0x17c   :  { %v2360_v54 = vpop.xlane.xlu1 %635 }
 0x17d   :  { %v2366_v6 = vpop.xlane.xlu0 %633 }
 0x184   :  { %v2364_v15 = vpop.xlane.xlu1 %639 }
 0x185   :  { %v2370_v30 = vpop.xlane.xlu0 %637 }
 0x188   :  { %v2368_v22 = vpop.xlane.xlu1 %643 }
 0x189   :  { %v2374_v32 = vpop.xlane.xlu0 %641 }
 0x18c   :  { %v2372_v3 = vpop.xlane.xlu1 %647 }
 0x18d   :  { %v2378_v19 = vpop.xlane.xlu0 %645 }
 0x190   :  { %v2376_v41 = vpop.xlane.xlu1 %651 }
 0x191   :  { %v2382_v46 = vpop.xlane.xlu0 %649 }
 0x194   :  { %v2380_v48 = vpop.xlane.xlu1 %655 }
 0x195   :  { %v2386_v33 = vpop.xlane.xlu0 %653 }
 0x198   :  { %v2384_v47 = vpop.xlane.xlu1 %659 }
 0x199   :  { %v2390_v31 = vpop.xlane.xlu0 %657 }
 0x19c   :  { %v2388_v62 = vpop.xlane.xlu1 %663 }
 0x19d   :  { %v2392_v51 = vpop.xlane.xlu0 %661 }
 0x1b5   :  { %v778_v63 = vpop.xlane.xlu1 %777 }
 0x1b6   :  { %1660 = vrcp.f32 %v778_v63 }
 0x1bc   :  { %v781_v11 = vpop.xlane.xlu0 %780 }
 0x1bd   :  { %1662 = vrcp.f32 %v781_v11 }
 0x1c3   :  { %v1661_v40 = vpop.eup %1660 }
 0x1c4   :  { %v816_v45 = vmul.f32 %v1661_v40, %v2272_v43  ;;  %v786_v1 = vrot.slane %v1661_v40, 1  ;;  %v787_v9 = vrot.slane %v1661_v40, 2  ;;  %v788_v23 = vrot.slane %v1661_v40, 3 }
 0x1c5   :  { %v789_v59 = vrot.slane %v1661_v40, 4  ;;  %v790_v58 = vrot.slane %v1661_v40, 5  ;;  %v791_v11 = vrot.slane %v1661_v40, 6 }
 0x1c6   :  { %v851_v38 = vrot.slane %v816_v45, %v2398_v61  ;;  %v817_v29 = vmul.f32 %v2270_v42, %v786_v1  ;;  %v818_v4 = vmul.f32 %v2274_v35, %v787_v9  ;;  %v819_v36 = vmul.f32 %v2276_v2, %v788_v23 }
 0x1c7   :  { %v820_v63 = vmul.f32 %v2278_v56, %v789_v59  ;;  %v821_v35 = vmul.f32 %v2283_v44, %v790_v58  ;;  %v822_v2 = vmul.f32 %v2287_v20, %v791_v11 }
 0x1c8   :  { %857 = vbcast.lane.b32.xlu1 %v851_v38, 264  ;;  %853 = vbcast.lane.b32.xlu0 %v851_v38, 256  ;;  %v862_v43 = vrot.slane %v817_v29, %v2398_v61  ;;  %v873_v16 = vrot.slane %v818_v4, %v2398_v61  ;;  %v792_v38 = vrot.slane %v1661_v40, 7 }
 0x1c9   :  { %v895_v42 = vrot.slane %v820_v63, %v2398_v61  ;;  %v906_v45 = vrot.slane %v821_v35, %v2398_v61  ;;  %v917_v1 = vrot.slane %v822_v2, %v2398_v61  ;;  %v2444_v35 = vpop.xlane.xlu0 %665 }
 0x1ca   :  { %v2402_v5 = vpop.eup %1662  ;;  %v823_v56 = vmul.f32 %v2299_v14, %v792_v38 }
 0x1cb   :  { %v824_v34 = vmul.f32 %v2402_v5, %v2291_v13  ;;  %v884_v13 = vrot.slane %v819_v36, %v2398_v61  ;;  %v793_v9 = vrot.slane %v2402_v5, 1  ;;  %v795_v29 = vrot.slane %v2402_v5, 3 }
 0x1cc   :  { %v928_v44 = vrot.slane %v823_v56, %v2398_v61  ;;  %v796_v23 = vrot.slane %v2402_v5, 4  ;;  %v798_v59 = vrot.slane %v2402_v5, 6  ;;  %v799_v63 = vrot.slane %v2402_v5, 7 }
 0x1cd   :  { %v939_v17 = vrot.slane %v824_v34, %v2398_v61  ;;  %v825_v34 = vmul.f32 %v2295_v24, %v793_v9  ;;  %v827_v4 = vmul.f32 %v2307_v12, %v795_v29 }
 0x1ce   :  { %v831_v58 = vmul.f32 %v2321_v53, %v799_v63 }
 0x1cf   :  { %945 = vbcast.lane.b32.xlu1 %v939_v17, 264  ;;  %941 = vbcast.lane.b32.xlu0 %v939_v17, 256  ;;  %v794_v17 = vrot.slane %v2402_v5, 2  ;;  %v950_v20 = vrot.slane %v825_v34, %v2398_v61  ;;  %v972_v24 = vrot.slane %v827_v4, %v2398_v61 }
 0x1d1   :  { %v826_v40 = vmul.f32 %v2303_v7, %v794_v17 }
 0x1d3   :  { %864 = vbcast.lane.b32.xlu1 %v862_v43, 256  ;;  %875 = vbcast.lane.b32.xlu0 %v873_v16, 256  ;;  %v961_v14 = vrot.slane %v826_v40, %v2398_v61 }
 0x1d7   :  { %868 = vbcast.lane.b32.xlu1 %v862_v43, 264  ;;  %886 = vbcast.lane.b32.xlu0 %v884_v13, 256  ;;  %v828_v43 = vmul.f32 %v2310_v10, %v796_v23 }
 0x1d9   :  { %v983_v7 = vrot.slane %v828_v43, %v2398_v61 }
 0x1db   :  { %879 = vbcast.lane.b32.xlu1 %v873_v16, 264  ;;  %897 = vbcast.lane.b32.xlu0 %v895_v42, 256  ;;  %v797_v16 = vrot.slane %v2402_v5, 5  ;;  %v2448_v5 = vpop.xlane.xlu0 %669 }
 0x1dd   :  { %v829_v36 = vmul.f32 %v2315_v28, %v797_v16  ;;  %v1016_v28 = vrot.slane %v831_v58, %v2398_v61 }
 0x1df   :  { %890 = vbcast.lane.b32.xlu1 %v884_v13, 264  ;;  %908 = vbcast.lane.b32.xlu0 %v906_v45, 256  ;;  %v994_v12 = vrot.slane %v829_v36, %v2398_v61  ;;  %v830_v13 = vmul.f32 %v2325_v27, %v798_v59 }
 0x1e1   :  { %v1005_v10 = vrot.slane %v830_v13, %v2398_v61 }
 0x1e3   :  { %901 = vbcast.lane.b32.xlu1 %v895_v42, 264  ;;  %919 = vbcast.lane.b32.xlu0 %v917_v1, 256  ;;  %v2442_v42 = vpop.xlane.xlu1 %667 }
 0x1e7   :  { %912 = vbcast.lane.b32.xlu1 %v906_v45, 264  ;;  %930 = vbcast.lane.b32.xlu0 %v928_v44, 256  ;;  %v2446_v27 = vpop.xlane.xlu1 %671 }
 0x1eb   :  { %923 = vbcast.lane.b32.xlu1 %v917_v1, 264  ;;  %952 = vbcast.lane.b32.xlu0 %v950_v20, 256 }
 0x1ef   :  { %934 = vbcast.lane.b32.xlu1 %v928_v44, 264  ;;  %963 = vbcast.lane.b32.xlu0 %v961_v14, 256 }
 0x1f3   :  { %956 = vbcast.lane.b32.xlu1 %v950_v20, 264  ;;  %974 = vbcast.lane.b32.xlu0 %v972_v24, 256 }
 0x1f7   :  { %967 = vbcast.lane.b32.xlu1 %v961_v14, 264  ;;  %985 = vbcast.lane.b32.xlu0 %v983_v7, 256 }
 0x1fb   :  { %978 = vbcast.lane.b32.xlu1 %v972_v24, 264  ;;  %996 = vbcast.lane.b32.xlu0 %v994_v12, 256 }
 0x1ff   :  { %989 = vbcast.lane.b32.xlu1 %v983_v7, 264  ;;  %1007 = vbcast.lane.b32.xlu0 %v1005_v10, 256 }
 0x203   :  { %1000 = vbcast.lane.b32.xlu1 %v994_v12, 264  ;;  %1018 = vbcast.lane.b32.xlu0 %v1016_v28, 256 }
 0x207   :  { %1011 = vbcast.lane.b32.xlu1 %v1005_v10, 264 }
 0x20b   :  { %1022 = vbcast.lane.b32.xlu1 %v1016_v28, 264 }
 0x23a   :  { %v858_v11 = vpop.permute.xlu1 %857  ;;  %v854_v45 = vpop.permute.xlu0 %853 }
 0x23b   :  { %v1057_v53 = vmul.f32 %v858_v11, %v2338_v8  ;;  %v1056_v2 = vmul.f32 %v854_v45, %v2342_v0 }
 0x23d   :  { %1124 = vperm.xlu1 %1403, %v1057_v53   ;;  %1121 = vperm.xlu0 %1402, %v1056_v2  }
 0x241   :  { %v946_v61 = vpop.permute.xlu1 %945  ;;  %v942_v38 = vpop.permute.xlu0 %941 }
 0x242   :  { %v1073_v1 = vmul.f32 %v946_v61, %v2368_v22  ;;  %v1072_v56 = vmul.f32 %v942_v38, %v2374_v32 }
 0x244   :  { %1172 = vperm.xlu0 %1402, %v1073_v1   ;;  %1169 = vperm.xlu1 %1403, %v1072_v56  }
 0x245   :  { %v865_v9 = vpop.permute.xlu1 %864  ;;  %v876_v44 = vpop.permute.xlu0 %875 }
 0x246   :  { %v1058_v34 = vmul.f32 %v865_v9, %v2346_v49  ;;  %v1060_v8 = vmul.f32 %v876_v44, %v2350_v60 }
 0x248   :  { %1127 = vperm.xlu1 %1403, %v1058_v34  }
 0x249   :  { %v869_v17 = vpop.permute.xlu1 %868  ;;  %v887_v20 = vpop.permute.xlu0 %886 }
 0x24a   :  { %v1059_v0 = vmul.f32 %v869_v17, %v2340_v57  ;;  %v1062_v22 = vmul.f32 %v887_v20, %v2354_v18 }
 0x24c   :  { %1130 = vperm.xlu0 %1402, %v1059_v0   ;;  %1133 = vperm.xlu1 %1403, %v1060_v8  }
 0x24d   :  { %v880_v40 = vpop.permute.xlu1 %879  ;;  %v898_v29 = vpop.permute.xlu0 %897 }
 0x24e   :  { %v1061_v32 = vmul.f32 %v880_v40, %v2344_v21  ;;  %v1064_v49 = vmul.f32 %v898_v29, %v2358_v37 }
 0x250   :  { %1136 = vperm.xlu0 %1402, %v1061_v32   ;;  %1139 = vperm.xlu1 %1403, %v1062_v22  }
 0x251   :  { %v891_v14 = vpop.permute.xlu1 %890  ;;  %v909_v4 = vpop.permute.xlu0 %908 }
 0x252   :  { %v1063_v23 = vmul.f32 %v891_v14, %v2348_v55  ;;  %v1066_v24 = vmul.f32 %v909_v4, %v2362_v25 }
 0x254   :  { %1142 = vperm.xlu0 %1402, %v1063_v23   ;;  %1145 = vperm.xlu1 %1403, %v1064_v49   ;;  %v1217_v23 = vand.u32 127, %v848_v52 }
 0x255   :  { %v902_v60 = vpop.permute.xlu1 %901  ;;  %v920_v57 = vpop.permute.xlu0 %919 }
 0x256   :  { %v1065_v43 = vmul.f32 %v902_v60, %v2352_v26  ;;  %v1068_v16 = vmul.f32 %v920_v57, %v2366_v6 }
 0x258   :  { %1148 = vperm.xlu0 %1402, %v1065_v43   ;;  %1151 = vperm.xlu1 %1403, %v1066_v24   ;;  %v1222_v24 = vadd.s32 4294967288, %v1217_v23 }
 0x259   :  { %v913_v18 = vpop.permute.xlu1 %912  ;;  %v931_v21 = vpop.permute.xlu0 %930 }
 0x25a   :  { %v1067_v7 = vmul.f32 %v913_v18, %v2356_v50 }
 0x25c   :  { %1154 = vperm.xlu0 %1402, %v1067_v7   ;;  %1157 = vperm.xlu1 %1403, %v1068_v16   ;;  %v2491_v16 = vsub.s32 %v1217_v23, %v2395_v39 }
 0x25d   :  { %v924_v37 = vpop.permute.xlu1 %923  ;;  %v953_v55 = vpop.permute.xlu0 %952 }
 0x25e   :  { %v1069_v36 = vmul.f32 %v924_v37, %v2360_v54  ;;  %v1074_v59 = vmul.f32 %v953_v55, %v2378_v19 }
 0x260   :  { %1160 = vperm.xlu0 %1402, %v1069_v36   ;;  %1175 = vperm.xlu1 %1403, %v1074_v59  }
 0x261   :  { %v935_v25 = vpop.permute.xlu1 %934  ;;  %v964_v26 = vpop.permute.xlu0 %963 }
 0x262   :  { %v1076_v12 = vmul.f32 %v964_v26, %v2382_v46 }
 0x264   :  { %1181 = vperm.xlu1 %1403, %v1076_v12  }
 0x265   :  { %v957_v13 = vpop.permute.xlu1 %956  ;;  %v975_v63 = vpop.permute.xlu0 %974 }
 0x266   :  { %v1075_v6 = vmul.f32 %v957_v13, %v2372_v3  ;;  %v1078_v50 = vmul.f32 %v975_v63, %v2386_v33 }
 0x268   :  { %1178 = vperm.xlu0 %1402, %v1075_v6   ;;  %1187 = vperm.xlu1 %1403, %v1078_v50  }
 0x269   :  { %v968_v10 = vpop.permute.xlu1 %967  ;;  %v986_v58 = vpop.permute.xlu0 %985 }
 0x26a   :  { %v1077_v54 = vmul.f32 %v968_v10, %v2376_v41  ;;  %v1080_v19 = vmul.f32 %v986_v58, %v2390_v31  ;;  %v1070_v31 = vmul.f32 %v931_v21, %v2370_v30  ;;  %v2488_v21 = vsub.s32 %v1222_v24, %v2395_v39 }
 0x26c   :  { %1184 = vperm.xlu0 %1402, %v1077_v54   ;;  %1193 = vperm.xlu1 %1403, %v1080_v19  }
 0x26d   :  { %v979_v28 = vpop.permute.xlu1 %978  ;;  %v997_v11 = vpop.permute.xlu0 %996 }
 0x26e   :  { %v1079_v46 = vmul.f32 %v979_v28, %v2380_v48  ;;  %v1082_v45 = vmul.f32 %v997_v11, %v2392_v51 }
 0x270   :  { %1190 = vperm.xlu0 %1402, %v1079_v46   ;;  %1199 = vperm.xlu1 %1403, %v1082_v45  }
 0x271   :  { %v990_v3 = vpop.permute.xlu1 %989  ;;  %v1008_v33 = vpop.permute.xlu0 %1007 }
 0x272   :  { %v1081_v53 = vmul.f32 %v990_v3, %v2384_v47  ;;  %v1084_v2 = vmul.f32 %v1008_v33, %v2444_v35  ;;  %v1071_v47 = vmul.f32 %v935_v25, %v2364_v15 }
 0x274   :  { %1196 = vperm.xlu0 %1402, %v1081_v53   ;;  %1205 = vperm.xlu1 %1403, %v1084_v2  }
 0x275   :  { %v1001_v41 = vpop.permute.xlu1 %1000  ;;  %v1019_v38 = vpop.permute.xlu0 %1018 }
 0x276   :  { %v1083_v61 = vmul.f32 %v1001_v41, %v2388_v62  ;;  %v1086_v51 = vmul.f32 %v1019_v38, %v2448_v5 }
 0x278   :  { %1202 = vperm.xlu0 %1402, %v1083_v61   ;;  %1163 = vperm.xlu1 %1403, %v1070_v31  }
 0x279   :  { %v1012_v48 = vpop.permute.xlu1 %1011 }
 0x27a   :  { %v1085_v1 = vmul.f32 %v1012_v48, %v2442_v42 }
 0x27c   :  { %1208 = vperm.xlu0 %1402, %v1085_v1   ;;  %1211 = vperm.xlu1 %1403, %v1086_v51  }
 0x27d   :  { %v1023_v35 = vpop.permute.xlu1 %1022 }
 0x27e   :  { %v1087_v56 = vmul.f32 %v1023_v35, %v2446_v27 }
 0x280   :  { %1166 = vperm.xlu0 %1402, %v1071_v47  }
 0x284   :  { %1214 = vperm.xlu0 %1402, %v1087_v56  }
 0x2b8   :  { %v1125_v30 = vpop.permute.xlu1 %1124  ;;  %v1122_v9 = vpop.permute.xlu0 %1121 }
 0x2b9   :  { %v1226_v52 = vrot.slane %v1125_v30, %v2488_v21  ;;  %v1221_v36 = vrot.slane %v1122_v9, %v2491_v16 }
 0x2bb   :  { %v1228_v19 = vsel %vm1227_vm9, %v1226_v52, %v1221_v36 }
 0x2bf   :  { %v1170_v62 = vpop.permute.xlu1 %1169  ;;  %v1173_v44 = vpop.permute.xlu0 %1172 }
 0x2c0   :  { %v1295_v13 = vrot.slane %v1170_v62, %v2491_v16  ;;  %v1299_v63 = vrot.slane %v1173_v44, %v2488_v21 }
 0x2c2   :  { %v1300_v33 = vsel %vm1227_vm9, %v1299_v63, %v1295_v13 }
 0x2c3   :  { %v1128_v34 = vpop.permute.xlu1 %1127 }
 0x2c4   :  { %v1232_v59 = vrot.slane %v1128_v34, %v2491_v16 }
 0x2c7   :  { %v1134_v17 = vpop.permute.xlu1 %1133  ;;  %v1131_v20 = vpop.permute.xlu0 %1130 }
 0x2c8   :  { %v1236_v7 = vrot.slane %v1131_v20, %v2488_v21  ;;  %v1241_v12 = vrot.slane %v1134_v17, %v2491_v16 }
 0x2ca   :  { %v1237_v6 = vsel %vm1227_vm9, %v1236_v7, %v1232_v59 }
 0x2cb   :  { %v1140_v8 = vpop.permute.xlu1 %1139  ;;  %v1137_v5 = vpop.permute.xlu0 %1136  ;;  %v1364_v11 = vsel %vm753_vm2, %v1237_v6, %v1228_v19 }
 0x2cc   :  { %v1245_v55 = vrot.slane %v1137_v5, %v2488_v21  ;;  %v1250_v50 = vrot.slane %v1140_v8, %v2491_v16 }
 0x2ce   :  { %v1246_v58 = vsel %vm1227_vm9, %v1245_v55, %v1241_v12 }
 0x2cf   :  { %v1146_v0 = vpop.permute.xlu1 %1145  ;;  %v1143_v42 = vpop.permute.xlu0 %1142  ;;  %v1365_v53 = vsel %vm755_vm3, %v1246_v58, %v1364_v11 }
 0x2d0   :  { %v1254_v25 = vrot.slane %v1143_v42, %v2488_v21  ;;  %v1259_v54 = vrot.slane %v1146_v0, %v2491_v16 }
 0x2d2   :  { %v1255_v28 = vsel %vm1227_vm9, %v1254_v25, %v1250_v50 }
 0x2d3   :  { %v1152_v40 = vpop.permute.xlu1 %1151  ;;  %v1149_v29 = vpop.permute.xlu0 %1148  ;;  %v1366_v38 = vsel %vm757_vm4, %v1255_v28, %v1365_v53 }
 0x2d4   :  { %v1263_v39 = vrot.slane %v1149_v29, %v2488_v21  ;;  %v1268_v48 = vrot.slane %v1152_v40, %v2491_v16 }
 0x2d6   :  { %v1264_v46 = vsel %vm1227_vm9, %v1263_v39, %v1259_v54 }
 0x2d7   :  { %v1158_v22 = vpop.permute.xlu1 %1157  ;;  %v1155_v15 = vpop.permute.xlu0 %1154  ;;  %v1367_v47 = vsel %vm759_vm5, %v1264_v46, %v1366_v38 }
 0x2d8   :  { %v1272_v45 = vrot.slane %v1155_v15, %v2488_v21  ;;  %v1277_v35 = vrot.slane %v1158_v22, %v2491_v16 }
 0x2da   :  { %v1273_v9 = vsel %vm1227_vm9, %v1272_v45, %v1268_v48 }
 0x2db   :  { %v1176_v32 = vpop.permute.xlu1 %1175  ;;  %v1161_v14 = vpop.permute.xlu0 %1160  ;;  %v1368_v15 = vsel %vm761_vm6, %v1273_v9, %v1367_v47 }
 0x2dc   :  { %v1281_v2 = vrot.slane %v1161_v14, %v2488_v21  ;;  %v1304_v51 = vrot.slane %v1176_v32, %v2491_v16 }
 0x2de   :  { %v1282_v17 = vsel %vm1227_vm9, %v1281_v2, %v1277_v35 }
 0x2df   :  { %v1182_v4 = vpop.permute.xlu1 %1181 }
 0x2e0   :  { %v1313_v56 = vrot.slane %v1182_v4, %v2491_v16 }
 0x2e3   :  { %v1188_v27 = vpop.permute.xlu1 %1187  ;;  %v1179_v49 = vpop.permute.xlu0 %1178 }
 0x2e4   :  { %v1308_v3 = vrot.slane %v1179_v49, %v2488_v21  ;;  %v1322_v62 = vrot.slane %v1188_v27, %v2491_v16  ;;  %v1369_v49 = vsel %vm763_vm7, %v1282_v17, %v1368_v15 }
 0x2e6   :  { %v1309_v44 = vsel %vm1227_vm9, %v1308_v3, %v1304_v51 }
 0x2e7   :  { %v2483_v60 = vpop.permute.xlu1 %1193  ;;  %v1185_v57 = vpop.permute.xlu0 %1184  ;;  %v1371_v32 = vsel %vm753_vm2, %v1309_v44, %v1300_v33 }
 0x2e8   :  { %v1317_v41 = vrot.slane %v1185_v57, %v2488_v21  ;;  %v1331_v20 = vrot.slane %v2483_v60, %v2491_v16 }
 0x2ea   :  { %v1318_v8 = vsel %vm1227_vm9, %v1317_v41, %v1313_v56 }
 0x2eb   :  { %v2485_v43 = vpop.permute.xlu1 %1199  ;;  %v1191_v18 = vpop.permute.xlu0 %1190  ;;  %v1372_v23 = vsel %vm755_vm3, %v1318_v8, %v1371_v32 }
 0x2ec   :  { %v1326_v1 = vrot.slane %v1191_v18, %v2488_v21  ;;  %v1340_v42 = vrot.slane %v2485_v43, %v2491_v16 }
 0x2ee   :  { %v1327_v40 = vsel %vm1227_vm9, %v1326_v1, %v1322_v62 }
 0x2ef   :  { %v1197_v37 = vpop.permute.xlu0 %1196  ;;  %v1206_v26 = vpop.permute.xlu1 %1205  ;;  %v1373_v24 = vsel %vm757_vm4, %v1327_v40, %v1372_v23 }
 0x2f0   :  { %v1335_v30 = vrot.slane %v1197_v37, %v2488_v21  ;;  %v1349_v14 = vrot.slane %v1206_v26, %v2491_v16 }
 0x2f2   :  { %v1336_v4 = vsel %vm1227_vm9, %v1335_v30, %v1331_v20 }
 0x2f3   :  { %v1203_v10 = vpop.permute.xlu0 %1202  ;;  %v1164_v31 = vpop.permute.xlu1 %1163  ;;  %v1374_v37 = vsel %vm759_vm5, %v1336_v4, %v1373_v24 }
 0x2f4   :  { %v1344_v34 = vrot.slane %v1203_v10, %v2488_v21  ;;  %v1286_v29 = vrot.slane %v1164_v31, %v2491_v16 }
 0x2f6   :  { %v1345_v60 = vsel %vm1227_vm9, %v1344_v34, %v1340_v42 }
 0x2f7   :  { %v1209_v61 = vpop.permute.xlu0 %1208  ;;  %v1212_v27 = vpop.permute.xlu1 %1211  ;;  %v1375_v36 = vsel %vm761_vm6, %v1345_v60, %v1374_v37 }
 0x2f8   :  { %v1353_v5 = vrot.slane %v1209_v61, %v2488_v21  ;;  %v1358_v55 = vrot.slane %v1212_v27, %v2491_v16 }
 0x2fa   :  { %v1354_v43 = vsel %vm1227_vm9, %v1353_v5, %v1349_v14 }
 0x2fb   :  { %v1167_v0 = vpop.permute.xlu0 %1166  ;;  %v1376_v59 = vsel %vm763_vm7, %v1354_v43, %v1375_v36 }
 0x2fc   :  { %v1290_v22 = vrot.slane %v1167_v0, %v2488_v21 }
 0x2fe   :  { %v1291_v57 = vsel %vm1227_vm9, %v1290_v22, %v1286_v29 }
 0x2ff   :  { %v1370_v18 = vsel %vm765_vm8, %v1291_v57, %v1369_v49  ;;  %v1215_v7 = vpop.permute.xlu0 %1214 }
 0x300   :  { %1380 = vst.msk [vmem:[#allocation2] sm:$0xff] %vm271_vm0, %v1370_v18  ;;  %v1362_v52 = vrot.slane %v1215_v7, %v2488_v21 }
 0x302   :  { %v1363_v25 = vsel %vm1227_vm9, %v1362_v52, %v1358_v55 }
 0x303   :  { %v1377_v26 = vsel %vm765_vm8, %v1363_v25, %v1376_v59 }
 0x304   :  { %1381 = vst.msk [vmem:[#allocation2 + $0x8] sm:$0xff] %vm271_vm0, %v1377_v26 }
 0x305   :  { %1675 = shalt.err (!%p1672_p4)
}
 0x306   :  { %s1688_s11 = smov 128   ;;  %s1689_s12 = smov 8  }
 0x307   :  { %1393 = dma.vmem_to_hbm [thread:$0]  %s1388_s9, 256, %s2565_s3, [#allocation3], %s1688_s11, %s1688_s11, %s1689_s12  }
 0x308   :  { %1684 = dma.done.wait [#allocation3], 256  }
 0x309   :  { %1685 = vsyncadd [#allocation3], 4294967040 }
 0x30a   :  { %1397 = vsyncpa [#allocation3], 1 }

</bundles_post_ra>
